<compile_context>
chip_gen: v7x
topology: tpu7x:2x2x1
jax: 0.10.0
libtpu: 0.0.40
codegen_flags: <defaults>
</compile_context>

<pallas_src>
import math
import jax
import jax.numpy as jnp
from jax.experimental import pallas as pl
from jax.experimental.pallas import tpu as pltpu  # noqa: F401  (kept for parity)


# ------------------------------ fused kernel ---------------------------------

def _make_fused_kernel(B, W, S, F, H, n1, n2):
    BW = B * W

    def lstm_cell(gates, c):
        # g-gate columns were pre-scaled by 2 host-side, so a single sigmoid
        # over the lane-dense (rows, 4H) gates vreg serves all gates:
        #   i, f, o = sigmoid(raw);  g = tanh(raw) = 2*sigmoid(2*raw) - 1.
        # One EUP op instead of two on the serial path; reconstruction is VPU.
        sg = jax.nn.sigmoid(gates)
        i_g = sg[:, 0 * H:1 * H]
        f_g = sg[:, 1 * H:2 * H]
        g_g = 2.0 * sg[:, 2 * H:3 * H] - 1.0
        o_g = sg[:, 3 * H:4 * H]
        c_new = f_g * c + i_g * g_g
        h_new = o_g * jnp.tanh(c_new)
        return h_new, c_new

    def run_stack(gx0, T, rows, whh0, hi_params):
        # Diagonal wavefront across layers: wavefront step p runs layer l at
        # time t = p - l.  Dependent-matmul chain = T + L - 1 (not L*T); all
        # matmuls within a step are independent, so the MXU pipelines them,
        # and no inter-layer sequence buffer is needed.
        # gx0: (T*rows, 4H) hoisted input projection (bias already added).
        L = 1 + len(hi_params)
        h = [jnp.zeros((rows, H), jnp.float32) for _ in range(L)]
        c = [jnp.zeros((rows, H), jnp.float32) for _ in range(L)]
        for p in range(T + L - 1):                    # fully unrolled, static
            h_prev = list(h)                          # snapshot of step p-1 state
            if p < T:                                 # layer 0, time p
                g0 = gx0[p * rows:(p + 1) * rows, :] + jnp.dot(
                    h_prev[0], whh0, preferred_element_type=jnp.float32)
                h[0], c[0] = lstm_cell(g0, c[0])
            for li in range(1, L):                    # layer li, time p - li
                t = p - li
                if 0 <= t < T:
                    wih, whh, b = hi_params[li - 1]
                    # == [h_{li-1,t} | h_{li,t-1}] @ [wih; whh] + b, as two
                    # independent dots (no lane-concat relayout on the chain).
                    gl = (jnp.dot(h_prev[li - 1], wih,
                                  preferred_element_type=jnp.float32)
                          + jnp.dot(h_prev[li], whh,
                                    preferred_element_type=jnp.float32)
                          + b)
                    h[li], c[li] = lstm_cell(gl, c[li])
        return h[L - 1]

    def kernel(*refs):
        # refs = x, n1*(wih,whh,b), n2*(wih,whh,b), fc_w, fc_b, out
        x_ref = refs[0]
        idx = 1
        p1 = [tuple(r[...] for r in refs[idx + 3 * i: idx + 3 * i + 3])
              for i in range(n1)]
        idx += 3 * n1
        p2 = [tuple(r[...] for r in refs[idx + 3 * i: idx + 3 * i + 3])
              for i in range(n2)]
        idx += 3 * n2
        fcw = refs[idx][...]
        fcb = refs[idx + 1][...]
        out_ref = refs[idx + 2]

        # ---- lstm1: B*W windows, T = S.  Rows inside each timestep are
        # ordered w*B + b (host-side reorder), so the final hidden below is
        # already lstm2's time-major input -- no in-kernel permutation. -----
        wih1_0, whh1_0, b1_0 = p1[0]
        gx1 = jnp.dot(x_ref[...], wih1_0,
                      preferred_element_type=jnp.float32) + b1_0
        h1 = run_stack(gx1, S, BW, whh1_0, p1[1:])     # (W*B, H), row = w*B + b

        # ---- lstm2: batch B, T = W (hoisted projection straight off h1) ----
        wih2_0, whh2_0, b2_0 = p2[0]
        gx2 = jnp.dot(h1, wih2_0,
                      preferred_element_type=jnp.float32) + b2_0
        h2 = run_stack(gx2, W, B, whh2_0, p2[1:])      # (B, H)

        # ---- fc + sigmoid fused --------------------------------------------
        y = jnp.dot(h2, fcw, preferred_element_type=jnp.float32) + fcb
        out_ref[...] = jax.nn.sigmoid(y).astype(out_ref.dtype)

    return kernel


# --------------------------------- forward ------------------------------------

def _scale_g_columns(a, H):
    # Fold tanh into the single gate sigmoid: tanh(x) = 2*sigmoid(2x) - 1,
    # so pre-scale the g-gate (cell-input) weight/bias columns by 2.
    return a.at[..., 2 * H:3 * H].multiply(2.0)


def model_forward(padded_input, params1, params2, fc_w_t, fc_b2d):
    B, W, S, F = padded_input.shape
    H = fc_w_t.shape[0]
    # Time-major flatten with row index s*(W*B) + w*B + b so lstm1's final
    # hidden is already lstm2's time-major input layout (pure host plumbing).
    x_tm = jnp.transpose(padded_input, (2, 1, 0, 3)).reshape(S * W * B, F)

    flat_in = [x_tm]
    for p in params1:
        flat_in.extend(_scale_g_columns(a, H) for a in p)
    for p in params2:
        flat_in.extend(_scale_g_columns(a, H) for a in p)
    flat_in += [fc_w_t, fc_b2d]

    kernel = _make_fused_kernel(B, W, S, F, H, len(params1), len(params2))
    return pl.pallas_call(
        kernel,
        out_shape=jax.ShapeDtypeStruct((B, 1), jnp.float32),
    )(*flat_in)


# ------------------------------ parameter setup -------------------------------

def init_lstm_params(key, num_layers, input_size, hidden_size):
    """PyTorch-style uniform(-1/sqrt(H), 1/sqrt(H)) init; weights pre-transposed."""
    params = []
    bound = 1.0 / math.sqrt(hidden_size)
    for layer in range(num_layers):
        in_sz = input_size if layer == 0 else hidden_size
        key, k1, k2, k3, k4 = jax.random.split(key, 5)
        w_ih = jax.random.uniform(k1, (4 * hidden_size, in_sz), jnp.float32, -bound, bound)
        w_hh = jax.random.uniform(k2, (4 * hidden_size, hidden_size), jnp.float32, -bound, bound)
        b_ih = jax.random.uniform(k3, (4 * hidden_size,), jnp.float32, -bound, bound)
        b_hh = jax.random.uniform(k4, (4 * hidden_size,), jnp.float32, -bound, bound)
        params.append((w_ih.T, w_hh.T, (b_ih + b_hh)[None, :]))
    return key, params


# ------------------------- pure-JAX reference (check) --------------------------

def _ref_lstm_stack(x_bf, layer_params):
    """x_bf: (N, T, I) batch-first. Returns final hidden of last layer (N, H)."""
    seq = x_bf
    h = None
    for (wih_t, whh_t, b) in layer_params:
        N, T, _ = seq.shape
        H = whh_t.shape[0]
        h = jnp.zeros((N, H), jnp.float32)
        c = jnp.zeros((N, H), jnp.float32)
        outs = []
        for t in range(T):
            g = seq[:, t, :] @ wih_t + h @ whh_t + b
            i_g = jax.nn.sigmoid(g[:, 0 * H:1 * H])
            f_g = jax.nn.sigmoid(g[:, 1 * H:2 * H])
            g_g = jnp.tanh(g[:, 2 * H:3 * H])
            o_g = jax.nn.sigmoid(g[:, 3 * H:4 * H])
            c = f_g * c + i_g * g_g
            h = o_g * jnp.tanh(c)
            outs.append(h)
        seq = jnp.stack(outs, axis=1)
    return h


def reference_forward(padded_input, params1, params2, fc_w_t, fc_b2d):
    B, W, S, F = padded_input.shape
    x = padded_input.reshape(B * W, S, F)
    h1 = _ref_lstm_stack(x, params1).reshape(B, W, -1)
    h2 = _ref_lstm_stack(h1, params2)
    return jax.nn.sigmoid(h2 @ fc_w_t + fc_b2d)


# ----------------------------------- main --------------------------------------

if __name__ == "__main__":
    # configs: enc_in=4, d_model=32, e_layers=2, dropout=0.0 (eval mode)
    enc_in, d_model, e_layers = 4, 32, 2
    batch, max_num_window, window_size = 2, 4, 8

    key = jax.random.PRNGKey(0)
    key, kx = jax.random.split(key)
    padded_input = jax.random.normal(
        kx, (batch, max_num_window, window_size, enc_in), jnp.float32)

    key, params1 = init_lstm_params(key, e_layers, enc_in, d_model)
    key, params2 = init_lstm_params(key, e_layers, d_model, d_model)

    bound = 1.0 / math.sqrt(d_model)
    key, kw, kb = jax.random.split(key, 3)
    fc_w = jax.random.uniform(kw, (1, d_model), jnp.float32, -bound, bound)
    fc_b = jax.random.uniform(kb, (1,), jnp.float32, -bound, bound)
    fc_w_t = fc_w.T                       # (d_model, 1)
    fc_b2d = fc_b[None, :]                # (1, 1)

    out = jax.jit(model_forward)(padded_input, params1, params2, fc_w_t, fc_b2d)
    out = jax.block_until_ready(out)
    assert out.shape == (batch, 1), out.shape

    ref = jax.jit(reference_forward)(padded_input, params1, params2, fc_w_t, fc_b2d)
    ref = jax.block_until_ready(ref)
    assert bool(jnp.allclose(out, ref, atol=1e-4, rtol=1e-4)), (out, ref)
    assert bool(jnp.all((out > 0.0) & (out < 1.0)))
    print("KERNEL_OK")
</pallas_src>

<mosaic_0001>
module attributes {stable_mosaic.version = 11 : i64} {
  func.func @kernel(%arg0: memref<64x4xf32, #tpu.memory_space<vmem>>, %arg1: memref<4x128xf32, #tpu.memory_space<vmem>>, %arg2: memref<32x128xf32, #tpu.memory_space<vmem>>, %arg3: memref<1x128xf32, #tpu.memory_space<vmem>>, %arg4: memref<32x128xf32, #tpu.memory_space<vmem>>, %arg5: memref<32x128xf32, #tpu.memory_space<vmem>>, %arg6: memref<1x128xf32, #tpu.memory_space<vmem>>, %arg7: memref<32x128xf32, #tpu.memory_space<vmem>>, %arg8: memref<32x128xf32, #tpu.memory_space<vmem>>, %arg9: memref<1x128xf32, #tpu.memory_space<vmem>>, %arg10: memref<32x128xf32, #tpu.memory_space<vmem>>, %arg11: memref<32x128xf32, #tpu.memory_space<vmem>>, %arg12: memref<1x128xf32, #tpu.memory_space<vmem>>, %arg13: memref<32x1xf32, #tpu.memory_space<vmem>>, %arg14: memref<1x1xf32, #tpu.memory_space<vmem>>, %arg15: memref<2x1xf32, #tpu.memory_space<vmem>>) attributes {dimension_semantics = [], scalar_prefetch = 0 : i64, scratch_operands = 0 : i64, tpu.core_type = #tpu.core_type<tc>} {
    %c0 = arith.constant 0 : index
    %c0_0 = arith.constant 0 : index
    %0 = vector.load %arg1[%c0, %c0_0] : memref<4x128xf32, #tpu.memory_space<vmem>>, vector<4x128xf32>
    %c0_1 = arith.constant 0 : index
    %c0_2 = arith.constant 0 : index
    %1 = vector.load %arg2[%c0_1, %c0_2] : memref<32x128xf32, #tpu.memory_space<vmem>>, vector<32x128xf32>
    %c0_3 = arith.constant 0 : index
    %c0_4 = arith.constant 0 : index
    %2 = vector.load %arg3[%c0_3, %c0_4] : memref<1x128xf32, #tpu.memory_space<vmem>>, vector<1x128xf32>
    %c0_5 = arith.constant 0 : index
    %c0_6 = arith.constant 0 : index
    %3 = vector.load %arg4[%c0_5, %c0_6] : memref<32x128xf32, #tpu.memory_space<vmem>>, vector<32x128xf32>
    %c0_7 = arith.constant 0 : index
    %c0_8 = arith.constant 0 : index
    %4 = vector.load %arg5[%c0_7, %c0_8] : memref<32x128xf32, #tpu.memory_space<vmem>>, vector<32x128xf32>
    %c0_9 = arith.constant 0 : index
    %c0_10 = arith.constant 0 : index
    %5 = vector.load %arg6[%c0_9, %c0_10] : memref<1x128xf32, #tpu.memory_space<vmem>>, vector<1x128xf32>
    %c0_11 = arith.constant 0 : index
    %c0_12 = arith.constant 0 : index
    %6 = vector.load %arg7[%c0_11, %c0_12] : memref<32x128xf32, #tpu.memory_space<vmem>>, vector<32x128xf32>
    %c0_13 = arith.constant 0 : index
    %c0_14 = arith.constant 0 : index
    %7 = vector.load %arg8[%c0_13, %c0_14] : memref<32x128xf32, #tpu.memory_space<vmem>>, vector<32x128xf32>
    %c0_15 = arith.constant 0 : index
    %c0_16 = arith.constant 0 : index
    %8 = vector.load %arg9[%c0_15, %c0_16] : memref<1x128xf32, #tpu.memory_space<vmem>>, vector<1x128xf32>
    %c0_17 = arith.constant 0 : index
    %c0_18 = arith.constant 0 : index
    %9 = vector.load %arg10[%c0_17, %c0_18] : memref<32x128xf32, #tpu.memory_space<vmem>>, vector<32x128xf32>
    %c0_19 = arith.constant 0 : index
    %c0_20 = arith.constant 0 : index
    %10 = vector.load %arg11[%c0_19, %c0_20] : memref<32x128xf32, #tpu.memory_space<vmem>>, vector<32x128xf32>
    %c0_21 = arith.constant 0 : index
    %c0_22 = arith.constant 0 : index
    %11 = vector.load %arg12[%c0_21, %c0_22] : memref<1x128xf32, #tpu.memory_space<vmem>>, vector<1x128xf32>
    %c0_23 = arith.constant 0 : index
    %c0_24 = arith.constant 0 : index
    %12 = vector.load %arg13[%c0_23, %c0_24] : memref<32x1xf32, #tpu.memory_space<vmem>>, vector<32x1xf32>
    %c0_25 = arith.constant 0 : index
    %c0_26 = arith.constant 0 : index
    %13 = vector.load %arg14[%c0_25, %c0_26] : memref<1x1xf32, #tpu.memory_space<vmem>>, vector<1x1xf32>
    %c0_27 = arith.constant 0 : index
    %c0_28 = arith.constant 0 : index
    %14 = vector.load %arg0[%c0_27, %c0_28] : memref<64x4xf32, #tpu.memory_space<vmem>>, vector<64x4xf32>
    %cst = arith.constant dense<0.000000e+00> : vector<64x128xf32>
    %15 = tpu.matmul %14, %0, %cst {dimension_numbers = #tpu.dot_dimension_numbers<[1], [0], [0], [1], [0, 0, 1, 1], [], []>} : vector<64x4xf32>, vector<4x128xf32>, vector<64x128xf32> -> vector<64x128xf32>
    %16 = vector.broadcast %2 : vector<1x128xf32> to vector<64x128xf32>
    %17 = arith.addf %15, %16 : vector<64x128xf32>
    %cst_29 = arith.constant 0.000000e+00 : f32
    %18 = vector.broadcast %cst_29 : f32 to vector<8x32xf32>
    %cst_30 = arith.constant 0.000000e+00 : f32
    %19 = vector.broadcast %cst_30 : f32 to vector<8x32xf32>
    %cst_31 = arith.constant 0.000000e+00 : f32
    %20 = vector.broadcast %cst_31 : f32 to vector<8x32xf32>
    %cst_32 = arith.constant 0.000000e+00 : f32
    %21 = vector.broadcast %cst_32 : f32 to vector<8x32xf32>
    %22 = vector.extract_strided_slice %17 {offsets = [0, 0], sizes = [8, 128], strides = [1, 1]} : vector<64x128xf32> to vector<8x128xf32>
    %cst_33 = arith.constant dense<0.000000e+00> : vector<8x128xf32>
    %23 = tpu.matmul %18, %1, %cst_33 {dimension_numbers = #tpu.dot_dimension_numbers<[1], [0], [0], [1], [0, 0, 1, 1], [], []>} : vector<8x32xf32>, vector<32x128xf32>, vector<8x128xf32> -> vector<8x128xf32>
    %24 = arith.addf %22, %23 : vector<8x128xf32>
    %25 = arith.negf %24 : vector<8x128xf32>
    %26 = math.exp %25 : vector<8x128xf32>
    %cst_34 = arith.constant 1.000000e+00 : f32
    %27 = vector.broadcast %cst_34 : f32 to vector<8x128xf32>
    %28 = arith.addf %27, %26 : vector<8x128xf32>
    %29 = arith.divf %27, %28 : vector<8x128xf32>
    %30 = vector.extract_strided_slice %29 {offsets = [0, 0], sizes = [8, 32], strides = [1, 1]} : vector<8x128xf32> to vector<8x32xf32>
    %31 = vector.extract_strided_slice %29 {offsets = [0, 32], sizes = [8, 32], strides = [1, 1]} : vector<8x128xf32> to vector<8x32xf32>
    %32 = vector.extract_strided_slice %29 {offsets = [0, 64], sizes = [8, 32], strides = [1, 1]} : vector<8x128xf32> to vector<8x32xf32>
    %cst_35 = arith.constant 2.000000e+00 : f32
    %33 = vector.broadcast %cst_35 : f32 to vector<8x32xf32>
    %34 = arith.mulf %33, %32 : vector<8x32xf32>
    %cst_36 = arith.constant 1.000000e+00 : f32
    %35 = vector.broadcast %cst_36 : f32 to vector<8x32xf32>
    %36 = arith.subf %34, %35 : vector<8x32xf32>
    %37 = vector.extract_strided_slice %29 {offsets = [0, 96], sizes = [8, 32], strides = [1, 1]} : vector<8x128xf32> to vector<8x32xf32>
    %38 = arith.mulf %31, %20 : vector<8x32xf32>
    %39 = arith.mulf %30, %36 : vector<8x32xf32>
    %40 = arith.addf %38, %39 : vector<8x32xf32>
    %41 = math.tanh %40 : vector<8x32xf32>
    %42 = arith.mulf %37, %41 : vector<8x32xf32>
    %43 = vector.extract_strided_slice %17 {offsets = [8, 0], sizes = [8, 128], strides = [1, 1]} : vector<64x128xf32> to vector<8x128xf32>
    %cst_37 = arith.constant dense<0.000000e+00> : vector<8x128xf32>
    %44 = tpu.matmul %42, %1, %cst_37 {dimension_numbers = #tpu.dot_dimension_numbers<[1], [0], [0], [1], [0, 0, 1, 1], [], []>} : vector<8x32xf32>, vector<32x128xf32>, vector<8x128xf32> -> vector<8x128xf32>
    %45 = arith.addf %43, %44 : vector<8x128xf32>
    %46 = arith.negf %45 : vector<8x128xf32>
    %47 = math.exp %46 : vector<8x128xf32>
    %cst_38 = arith.constant 1.000000e+00 : f32
    %48 = vector.broadcast %cst_38 : f32 to vector<8x128xf32>
    %49 = arith.addf %48, %47 : vector<8x128xf32>
    %50 = arith.divf %48, %49 : vector<8x128xf32>
    %51 = vector.extract_strided_slice %50 {offsets = [0, 0], sizes = [8, 32], strides = [1, 1]} : vector<8x128xf32> to vector<8x32xf32>
    %52 = vector.extract_strided_slice %50 {offsets = [0, 32], sizes = [8, 32], strides = [1, 1]} : vector<8x128xf32> to vector<8x32xf32>
    %53 = vector.extract_strided_slice %50 {offsets = [0, 64], sizes = [8, 32], strides = [1, 1]} : vector<8x128xf32> to vector<8x32xf32>
    %cst_39 = arith.constant 2.000000e+00 : f32
    %54 = vector.broadcast %cst_39 : f32 to vector<8x32xf32>
    %55 = arith.mulf %54, %53 : vector<8x32xf32>
    %cst_40 = arith.constant 1.000000e+00 : f32
    %56 = vector.broadcast %cst_40 : f32 to vector<8x32xf32>
    %57 = arith.subf %55, %56 : vector<8x32xf32>
    %58 = vector.extract_strided_slice %50 {offsets = [0, 96], sizes = [8, 32], strides = [1, 1]} : vector<8x128xf32> to vector<8x32xf32>
    %59 = arith.mulf %52, %40 : vector<8x32xf32>
    %60 = arith.mulf %51, %57 : vector<8x32xf32>
    %61 = arith.addf %59, %60 : vector<8x32xf32>
    %62 = math.tanh %61 : vector<8x32xf32>
    %63 = arith.mulf %58, %62 : vector<8x32xf32>
    %cst_41 = arith.constant dense<0.000000e+00> : vector<8x128xf32>
    %64 = tpu.matmul %42, %3, %cst_41 {dimension_numbers = #tpu.dot_dimension_numbers<[1], [0], [0], [1], [0, 0, 1, 1], [], []>} : vector<8x32xf32>, vector<32x128xf32>, vector<8x128xf32> -> vector<8x128xf32>
    %cst_42 = arith.constant dense<0.000000e+00> : vector<8x128xf32>
    %65 = tpu.matmul %19, %4, %cst_42 {dimension_numbers = #tpu.dot_dimension_numbers<[1], [0], [0], [1], [0, 0, 1, 1], [], []>} : vector<8x32xf32>, vector<32x128xf32>, vector<8x128xf32> -> vector<8x128xf32>
    %66 = arith.addf %64, %65 : vector<8x128xf32>
    %67 = vector.broadcast %5 : vector<1x128xf32> to vector<8x128xf32>
    %68 = arith.addf %66, %67 : vector<8x128xf32>
    %69 = arith.negf %68 : vector<8x128xf32>
    %70 = math.exp %69 : vector<8x128xf32>
    %cst_43 = arith.constant 1.000000e+00 : f32
    %71 = vector.broadcast %cst_43 : f32 to vector<8x128xf32>
    %72 = arith.addf %71, %70 : vector<8x128xf32>
    %73 = arith.divf %71, %72 : vector<8x128xf32>
    %74 = vector.extract_strided_slice %73 {offsets = [0, 0], sizes = [8, 32], strides = [1, 1]} : vector<8x128xf32> to vector<8x32xf32>
    %75 = vector.extract_strided_slice %73 {offsets = [0, 32], sizes = [8, 32], strides = [1, 1]} : vector<8x128xf32> to vector<8x32xf32>
    %76 = vector.extract_strided_slice %73 {offsets = [0, 64], sizes = [8, 32], strides = [1, 1]} : vector<8x128xf32> to vector<8x32xf32>
    %cst_44 = arith.constant 2.000000e+00 : f32
    %77 = vector.broadcast %cst_44 : f32 to vector<8x32xf32>
    %78 = arith.mulf %77, %76 : vector<8x32xf32>
    %cst_45 = arith.constant 1.000000e+00 : f32
    %79 = vector.broadcast %cst_45 : f32 to vector<8x32xf32>
    %80 = arith.subf %78, %79 : vector<8x32xf32>
    %81 = vector.extract_strided_slice %73 {offsets = [0, 96], sizes = [8, 32], strides = [1, 1]} : vector<8x128xf32> to vector<8x32xf32>
    %82 = arith.mulf %75, %21 : vector<8x32xf32>
    %83 = arith.mulf %74, %80 : vector<8x32xf32>
    %84 = arith.addf %82, %83 : vector<8x32xf32>
    %85 = math.tanh %84 : vector<8x32xf32>
    %86 = arith.mulf %81, %85 : vector<8x32xf32>
    %87 = vector.extract_strided_slice %17 {offsets = [16, 0], sizes = [8, 128], strides = [1, 1]} : vector<64x128xf32> to vector<8x128xf32>
    %cst_46 = arith.constant dense<0.000000e+00> : vector<8x128xf32>
    %88 = tpu.matmul %63, %1, %cst_46 {dimension_numbers = #tpu.dot_dimension_numbers<[1], [0], [0], [1], [0, 0, 1, 1], [], []>} : vector<8x32xf32>, vector<32x128xf32>, vector<8x128xf32> -> vector<8x128xf32>
    %89 = arith.addf %87, %88 : vector<8x128xf32>
    %90 = arith.negf %89 : vector<8x128xf32>
    %91 = math.exp %90 : vector<8x128xf32>
    %cst_47 = arith.constant 1.000000e+00 : f32
    %92 = vector.broadcast %cst_47 : f32 to vector<8x128xf32>
    %93 = arith.addf %92, %91 : vector<8x128xf32>
    %94 = arith.divf %92, %93 : vector<8x128xf32>
    %95 = vector.extract_strided_slice %94 {offsets = [0, 0], sizes = [8, 32], strides = [1, 1]} : vector<8x128xf32> to vector<8x32xf32>
    %96 = vector.extract_strided_slice %94 {offsets = [0, 32], sizes = [8, 32], strides = [1, 1]} : vector<8x128xf32> to vector<8x32xf32>
    %97 = vector.extract_strided_slice %94 {offsets = [0, 64], sizes = [8, 32], strides = [1, 1]} : vector<8x128xf32> to vector<8x32xf32>
    %cst_48 = arith.constant 2.000000e+00 : f32
    %98 = vector.broadcast %cst_48 : f32 to vector<8x32xf32>
    %99 = arith.mulf %98, %97 : vector<8x32xf32>
    %cst_49 = arith.constant 1.000000e+00 : f32
    %100 = vector.broadcast %cst_49 : f32 to vector<8x32xf32>
    %101 = arith.subf %99, %100 : vector<8x32xf32>
    %102 = vector.extract_strided_slice %94 {offsets = [0, 96], sizes = [8, 32], strides = [1, 1]} : vector<8x128xf32> to vector<8x32xf32>
    %103 = arith.mulf %96, %61 : vector<8x32xf32>
    %104 = arith.mulf %95, %101 : vector<8x32xf32>
    %105 = arith.addf %103, %104 : vector<8x32xf32>
    %106 = math.tanh %105 : vector<8x32xf32>
    %107 = arith.mulf %102, %106 : vector<8x32xf32>
    %cst_50 = arith.constant dense<0.000000e+00> : vector<8x128xf32>
    %108 = tpu.matmul %63, %3, %cst_50 {dimension_numbers = #tpu.dot_dimension_numbers<[1], [0], [0], [1], [0, 0, 1, 1], [], []>} : vector<8x32xf32>, vector<32x128xf32>, vector<8x128xf32> -> vector<8x128xf32>
    %cst_51 = arith.constant dense<0.000000e+00> : vector<8x128xf32>
    %109 = tpu.matmul %86, %4, %cst_51 {dimension_numbers = #tpu.dot_dimension_numbers<[1], [0], [0], [1], [0, 0, 1, 1], [], []>} : vector<8x32xf32>, vector<32x128xf32>, vector<8x128xf32> -> vector<8x128xf32>
    %110 = arith.addf %108, %109 : vector<8x128xf32>
    %111 = vector.broadcast %5 : vector<1x128xf32> to vector<8x128xf32>
    %112 = arith.addf %110, %111 : vector<8x128xf32>
    %113 = arith.negf %112 : vector<8x128xf32>
    %114 = math.exp %113 : vector<8x128xf32>
    %cst_52 = arith.constant 1.000000e+00 : f32
    %115 = vector.broadcast %cst_52 : f32 to vector<8x128xf32>
    %116 = arith.addf %115, %114 : vector<8x128xf32>
    %117 = arith.divf %115, %116 : vector<8x128xf32>
    %118 = vector.extract_strided_slice %117 {offsets = [0, 0], sizes = [8, 32], strides = [1, 1]} : vector<8x128xf32> to vector<8x32xf32>
    %119 = vector.extract_strided_slice %117 {offsets = [0, 32], sizes = [8, 32], strides = [1, 1]} : vector<8x128xf32> to vector<8x32xf32>
    %120 = vector.extract_strided_slice %117 {offsets = [0, 64], sizes = [8, 32], strides = [1, 1]} : vector<8x128xf32> to vector<8x32xf32>
    %cst_53 = arith.constant 2.000000e+00 : f32
    %121 = vector.broadcast %cst_53 : f32 to vector<8x32xf32>
    %122 = arith.mulf %121, %120 : vector<8x32xf32>
    %cst_54 = arith.constant 1.000000e+00 : f32
    %123 = vector.broadcast %cst_54 : f32 to vector<8x32xf32>
    %124 = arith.subf %122, %123 : vector<8x32xf32>
    %125 = vector.extract_strided_slice %117 {offsets = [0, 96], sizes = [8, 32], strides = [1, 1]} : vector<8x128xf32> to vector<8x32xf32>
    %126 = arith.mulf %119, %84 : vector<8x32xf32>
    %127 = arith.mulf %118, %124 : vector<8x32xf32>
    %128 = arith.addf %126, %127 : vector<8x32xf32>
    %129 = math.tanh %128 : vector<8x32xf32>
    %130 = arith.mulf %125, %129 : vector<8x32xf32>
    %131 = vector.extract_strided_slice %17 {offsets = [24, 0], sizes = [8, 128], strides = [1, 1]} : vector<64x128xf32> to vector<8x128xf32>
    %cst_55 = arith.constant dense<0.000000e+00> : vector<8x128xf32>
    %132 = tpu.matmul %107, %1, %cst_55 {dimension_numbers = #tpu.dot_dimension_numbers<[1], [0], [0], [1], [0, 0, 1, 1], [], []>} : vector<8x32xf32>, vector<32x128xf32>, vector<8x128xf32> -> vector<8x128xf32>
    %133 = arith.addf %131, %132 : vector<8x128xf32>
    %134 = arith.negf %133 : vector<8x128xf32>
    %135 = math.exp %134 : vector<8x128xf32>
    %cst_56 = arith.constant 1.000000e+00 : f32
    %136 = vector.broadcast %cst_56 : f32 to vector<8x128xf32>
    %137 = arith.addf %136, %135 : vector<8x128xf32>
    %138 = arith.divf %136, %137 : vector<8x128xf32>
    %139 = vector.extract_strided_slice %138 {offsets = [0, 0], sizes = [8, 32], strides = [1, 1]} : vector<8x128xf32> to vector<8x32xf32>
    %140 = vector.extract_strided_slice %138 {offsets = [0, 32], sizes = [8, 32], strides = [1, 1]} : vector<8x128xf32> to vector<8x32xf32>
    %141 = vector.extract_strided_slice %138 {offsets = [0, 64], sizes = [8, 32], strides = [1, 1]} : vector<8x128xf32> to vector<8x32xf32>
    %cst_57 = arith.constant 2.000000e+00 : f32
    %142 = vector.broadcast %cst_57 : f32 to vector<8x32xf32>
    %143 = arith.mulf %142, %141 : vector<8x32xf32>
    %cst_58 = arith.constant 1.000000e+00 : f32
    %144 = vector.broadcast %cst_58 : f32 to vector<8x32xf32>
    %145 = arith.subf %143, %144 : vector<8x32xf32>
    %146 = vector.extract_strided_slice %138 {offsets = [0, 96], sizes = [8, 32], strides = [1, 1]} : vector<8x128xf32> to vector<8x32xf32>
    %147 = arith.mulf %140, %105 : vector<8x32xf32>
    %148 = arith.mulf %139, %145 : vector<8x32xf32>
    %149 = arith.addf %147, %148 : vector<8x32xf32>
    %150 = math.tanh %149 : vector<8x32xf32>
    %151 = arith.mulf %146, %150 : vector<8x32xf32>
    %cst_59 = arith.constant dense<0.000000e+00> : vector<8x128xf32>
    %152 = tpu.matmul %107, %3, %cst_59 {dimension_numbers = #tpu.dot_dimension_numbers<[1], [0], [0], [1], [0, 0, 1, 1], [], []>} : vector<8x32xf32>, vector<32x128xf32>, vector<8x128xf32> -> vector<8x128xf32>
    %cst_60 = arith.constant dense<0.000000e+00> : vector<8x128xf32>
    %153 = tpu.matmul %130, %4, %cst_60 {dimension_numbers = #tpu.dot_dimension_numbers<[1], [0], [0], [1], [0, 0, 1, 1], [], []>} : vector<8x32xf32>, vector<32x128xf32>, vector<8x128xf32> -> vector<8x128xf32>
    %154 = arith.addf %152, %153 : vector<8x128xf32>
    %155 = vector.broadcast %5 : vector<1x128xf32> to vector<8x128xf32>
    %156 = arith.addf %154, %155 : vector<8x128xf32>
    %157 = arith.negf %156 : vector<8x128xf32>
    %158 = math.exp %157 : vector<8x128xf32>
    %cst_61 = arith.constant 1.000000e+00 : f32
    %159 = vector.broadcast %cst_61 : f32 to vector<8x128xf32>
    %160 = arith.addf %159, %158 : vector<8x128xf32>
    %161 = arith.divf %159, %160 : vector<8x128xf32>
    %162 = vector.extract_strided_slice %161 {offsets = [0, 0], sizes = [8, 32], strides = [1, 1]} : vector<8x128xf32> to vector<8x32xf32>
    %163 = vector.extract_strided_slice %161 {offsets = [0, 32], sizes = [8, 32], strides = [1, 1]} : vector<8x128xf32> to vector<8x32xf32>
    %164 = vector.extract_strided_slice %161 {offsets = [0, 64], sizes = [8, 32], strides = [1, 1]} : vector<8x128xf32> to vector<8x32xf32>
    %cst_62 = arith.constant 2.000000e+00 : f32
    %165 = vector.broadcast %cst_62 : f32 to vector<8x32xf32>
    %166 = arith.mulf %165, %164 : vector<8x32xf32>
    %cst_63 = arith.constant 1.000000e+00 : f32
    %167 = vector.broadcast %cst_63 : f32 to vector<8x32xf32>
    %168 = arith.subf %166, %167 : vector<8x32xf32>
    %169 = vector.extract_strided_slice %161 {offsets = [0, 96], sizes = [8, 32], strides = [1, 1]} : vector<8x128xf32> to vector<8x32xf32>
    %170 = arith.mulf %163, %128 : vector<8x32xf32>
    %171 = arith.mulf %162, %168 : vector<8x32xf32>
    %172 = arith.addf %170, %171 : vector<8x32xf32>
    %173 = math.tanh %172 : vector<8x32xf32>
    %174 = arith.mulf %169, %173 : vector<8x32xf32>
    %175 = vector.extract_strided_slice %17 {offsets = [32, 0], sizes = [8, 128], strides = [1, 1]} : vector<64x128xf32> to vector<8x128xf32>
    %cst_64 = arith.constant dense<0.000000e+00> : vector<8x128xf32>
    %176 = tpu.matmul %151, %1, %cst_64 {dimension_numbers = #tpu.dot_dimension_numbers<[1], [0], [0], [1], [0, 0, 1, 1], [], []>} : vector<8x32xf32>, vector<32x128xf32>, vector<8x128xf32> -> vector<8x128xf32>
    %177 = arith.addf %175, %176 : vector<8x128xf32>
    %178 = arith.negf %177 : vector<8x128xf32>
    %179 = math.exp %178 : vector<8x128xf32>
    %cst_65 = arith.constant 1.000000e+00 : f32
    %180 = vector.broadcast %cst_65 : f32 to vector<8x128xf32>
    %181 = arith.addf %180, %179 : vector<8x128xf32>
    %182 = arith.divf %180, %181 : vector<8x128xf32>
    %183 = vector.extract_strided_slice %182 {offsets = [0, 0], sizes = [8, 32], strides = [1, 1]} : vector<8x128xf32> to vector<8x32xf32>
    %184 = vector.extract_strided_slice %182 {offsets = [0, 32], sizes = [8, 32], strides = [1, 1]} : vector<8x128xf32> to vector<8x32xf32>
    %185 = vector.extract_strided_slice %182 {offsets = [0, 64], sizes = [8, 32], strides = [1, 1]} : vector<8x128xf32> to vector<8x32xf32>
    %cst_66 = arith.constant 2.000000e+00 : f32
    %186 = vector.broadcast %cst_66 : f32 to vector<8x32xf32>
    %187 = arith.mulf %186, %185 : vector<8x32xf32>
    %cst_67 = arith.constant 1.000000e+00 : f32
    %188 = vector.broadcast %cst_67 : f32 to vector<8x32xf32>
    %189 = arith.subf %187, %188 : vector<8x32xf32>
    %190 = vector.extract_strided_slice %182 {offsets = [0, 96], sizes = [8, 32], strides = [1, 1]} : vector<8x128xf32> to vector<8x32xf32>
    %191 = arith.mulf %184, %149 : vector<8x32xf32>
    %192 = arith.mulf %183, %189 : vector<8x32xf32>
    %193 = arith.addf %191, %192 : vector<8x32xf32>
    %194 = math.tanh %193 : vector<8x32xf32>
    %195 = arith.mulf %190, %194 : vector<8x32xf32>
    %cst_68 = arith.constant dense<0.000000e+00> : vector<8x128xf32>
    %196 = tpu.matmul %151, %3, %cst_68 {dimension_numbers = #tpu.dot_dimension_numbers<[1], [0], [0], [1], [0, 0, 1, 1], [], []>} : vector<8x32xf32>, vector<32x128xf32>, vector<8x128xf32> -> vector<8x128xf32>
    %cst_69 = arith.constant dense<0.000000e+00> : vector<8x128xf32>
    %197 = tpu.matmul %174, %4, %cst_69 {dimension_numbers = #tpu.dot_dimension_numbers<[1], [0], [0], [1], [0, 0, 1, 1], [], []>} : vector<8x32xf32>, vector<32x128xf32>, vector<8x128xf32> -> vector<8x128xf32>
    %198 = arith.addf %196, %197 : vector<8x128xf32>
    %199 = vector.broadcast %5 : vector<1x128xf32> to vector<8x128xf32>
    %200 = arith.addf %198, %199 : vector<8x128xf32>
    %201 = arith.negf %200 : vector<8x128xf32>
    %202 = math.exp %201 : vector<8x128xf32>
    %cst_70 = arith.constant 1.000000e+00 : f32
    %203 = vector.broadcast %cst_70 : f32 to vector<8x128xf32>
    %204 = arith.addf %203, %202 : vector<8x128xf32>
    %205 = arith.divf %203, %204 : vector<8x128xf32>
    %206 = vector.extract_strided_slice %205 {offsets = [0, 0], sizes = [8, 32], strides = [1, 1]} : vector<8x128xf32> to vector<8x32xf32>
    %207 = vector.extract_strided_slice %205 {offsets = [0, 32], sizes = [8, 32], strides = [1, 1]} : vector<8x128xf32> to vector<8x32xf32>
    %208 = vector.extract_strided_slice %205 {offsets = [0, 64], sizes = [8, 32], strides = [1, 1]} : vector<8x128xf32> to vector<8x32xf32>
    %cst_71 = arith.constant 2.000000e+00 : f32
    %209 = vector.broadcast %cst_71 : f32 to vector<8x32xf32>
    %210 = arith.mulf %209, %208 : vector<8x32xf32>
    %cst_72 = arith.constant 1.000000e+00 : f32
    %211 = vector.broadcast %cst_72 : f32 to vector<8x32xf32>
    %212 = arith.subf %210, %211 : vector<8x32xf32>
    %213 = vector.extract_strided_slice %205 {offsets = [0, 96], sizes = [8, 32], strides = [1, 1]} : vector<8x128xf32> to vector<8x32xf32>
    %214 = arith.mulf %207, %172 : vector<8x32xf32>
    %215 = arith.mulf %206, %212 : vector<8x32xf32>
    %216 = arith.addf %214, %215 : vector<8x32xf32>
    %217 = math.tanh %216 : vector<8x32xf32>
    %218 = arith.mulf %213, %217 : vector<8x32xf32>
    %219 = vector.extract_strided_slice %17 {offsets = [40, 0], sizes = [8, 128], strides = [1, 1]} : vector<64x128xf32> to vector<8x128xf32>
    %cst_73 = arith.constant dense<0.000000e+00> : vector<8x128xf32>
    %220 = tpu.matmul %195, %1, %cst_73 {dimension_numbers = #tpu.dot_dimension_numbers<[1], [0], [0], [1], [0, 0, 1, 1], [], []>} : vector<8x32xf32>, vector<32x128xf32>, vector<8x128xf32> -> vector<8x128xf32>
    %221 = arith.addf %219, %220 : vector<8x128xf32>
    %222 = arith.negf %221 : vector<8x128xf32>
    %223 = math.exp %222 : vector<8x128xf32>
    %cst_74 = arith.constant 1.000000e+00 : f32
    %224 = vector.broadcast %cst_74 : f32 to vector<8x128xf32>
    %225 = arith.addf %224, %223 : vector<8x128xf32>
    %226 = arith.divf %224, %225 : vector<8x128xf32>
    %227 = vector.extract_strided_slice %226 {offsets = [0, 0], sizes = [8, 32], strides = [1, 1]} : vector<8x128xf32> to vector<8x32xf32>
    %228 = vector.extract_strided_slice %226 {offsets = [0, 32], sizes = [8, 32], strides = [1, 1]} : vector<8x128xf32> to vector<8x32xf32>
    %229 = vector.extract_strided_slice %226 {offsets = [0, 64], sizes = [8, 32], strides = [1, 1]} : vector<8x128xf32> to vector<8x32xf32>
    %cst_75 = arith.constant 2.000000e+00 : f32
    %230 = vector.broadcast %cst_75 : f32 to vector<8x32xf32>
    %231 = arith.mulf %230, %229 : vector<8x32xf32>
    %cst_76 = arith.constant 1.000000e+00 : f32
    %232 = vector.broadcast %cst_76 : f32 to vector<8x32xf32>
    %233 = arith.subf %231, %232 : vector<8x32xf32>
    %234 = vector.extract_strided_slice %226 {offsets = [0, 96], sizes = [8, 32], strides = [1, 1]} : vector<8x128xf32> to vector<8x32xf32>
    %235 = arith.mulf %228, %193 : vector<8x32xf32>
    %236 = arith.mulf %227, %233 : vector<8x32xf32>
    %237 = arith.addf %235, %236 : vector<8x32xf32>
    %238 = math.tanh %237 : vector<8x32xf32>
    %239 = arith.mulf %234, %238 : vector<8x32xf32>
    %cst_77 = arith.constant dense<0.000000e+00> : vector<8x128xf32>
    %240 = tpu.matmul %195, %3, %cst_77 {dimension_numbers = #tpu.dot_dimension_numbers<[1], [0], [0], [1], [0, 0, 1, 1], [], []>} : vector<8x32xf32>, vector<32x128xf32>, vector<8x128xf32> -> vector<8x128xf32>
    %cst_78 = arith.constant dense<0.000000e+00> : vector<8x128xf32>
    %241 = tpu.matmul %218, %4, %cst_78 {dimension_numbers = #tpu.dot_dimension_numbers<[1], [0], [0], [1], [0, 0, 1, 1], [], []>} : vector<8x32xf32>, vector<32x128xf32>, vector<8x128xf32> -> vector<8x128xf32>
    %242 = arith.addf %240, %241 : vector<8x128xf32>
    %243 = vector.broadcast %5 : vector<1x128xf32> to vector<8x128xf32>
    %244 = arith.addf %242, %243 : vector<8x128xf32>
    %245 = arith.negf %244 : vector<8x128xf32>
    %246 = math.exp %245 : vector<8x128xf32>
    %cst_79 = arith.constant 1.000000e+00 : f32
    %247 = vector.broadcast %cst_79 : f32 to vector<8x128xf32>
    %248 = arith.addf %247, %246 : vector<8x128xf32>
    %249 = arith.divf %247, %248 : vector<8x128xf32>
    %250 = vector.extract_strided_slice %249 {offsets = [0, 0], sizes = [8, 32], strides = [1, 1]} : vector<8x128xf32> to vector<8x32xf32>
    %251 = vector.extract_strided_slice %249 {offsets = [0, 32], sizes = [8, 32], strides = [1, 1]} : vector<8x128xf32> to vector<8x32xf32>
    %252 = vector.extract_strided_slice %249 {offsets = [0, 64], sizes = [8, 32], strides = [1, 1]} : vector<8x128xf32> to vector<8x32xf32>
    %cst_80 = arith.constant 2.000000e+00 : f32
    %253 = vector.broadcast %cst_80 : f32 to vector<8x32xf32>
    %254 = arith.mulf %253, %252 : vector<8x32xf32>
    %cst_81 = arith.constant 1.000000e+00 : f32
    %255 = vector.broadcast %cst_81 : f32 to vector<8x32xf32>
    %256 = arith.subf %254, %255 : vector<8x32xf32>
    %257 = vector.extract_strided_slice %249 {offsets = [0, 96], sizes = [8, 32], strides = [1, 1]} : vector<8x128xf32> to vector<8x32xf32>
    %258 = arith.mulf %251, %216 : vector<8x32xf32>
    %259 = arith.mulf %250, %256 : vector<8x32xf32>
    %260 = arith.addf %258, %259 : vector<8x32xf32>
    %261 = math.tanh %260 : vector<8x32xf32>
    %262 = arith.mulf %257, %261 : vector<8x32xf32>
    %263 = vector.extract_strided_slice %17 {offsets = [48, 0], sizes = [8, 128], strides = [1, 1]} : vector<64x128xf32> to vector<8x128xf32>
    %cst_82 = arith.constant dense<0.000000e+00> : vector<8x128xf32>
    %264 = tpu.matmul %239, %1, %cst_82 {dimension_numbers = #tpu.dot_dimension_numbers<[1], [0], [0], [1], [0, 0, 1, 1], [], []>} : vector<8x32xf32>, vector<32x128xf32>, vector<8x128xf32> -> vector<8x128xf32>
    %265 = arith.addf %263, %264 : vector<8x128xf32>
    %266 = arith.negf %265 : vector<8x128xf32>
    %267 = math.exp %266 : vector<8x128xf32>
    %cst_83 = arith.constant 1.000000e+00 : f32
    %268 = vector.broadcast %cst_83 : f32 to vector<8x128xf32>
    %269 = arith.addf %268, %267 : vector<8x128xf32>
    %270 = arith.divf %268, %269 : vector<8x128xf32>
    %271 = vector.extract_strided_slice %270 {offsets = [0, 0], sizes = [8, 32], strides = [1, 1]} : vector<8x128xf32> to vector<8x32xf32>
    %272 = vector.extract_strided_slice %270 {offsets = [0, 32], sizes = [8, 32], strides = [1, 1]} : vector<8x128xf32> to vector<8x32xf32>
    %273 = vector.extract_strided_slice %270 {offsets = [0, 64], sizes = [8, 32], strides = [1, 1]} : vector<8x128xf32> to vector<8x32xf32>
    %cst_84 = arith.constant 2.000000e+00 : f32
    %274 = vector.broadcast %cst_84 : f32 to vector<8x32xf32>
    %275 = arith.mulf %274, %273 : vector<8x32xf32>
    %cst_85 = arith.constant 1.000000e+00 : f32
    %276 = vector.broadcast %cst_85 : f32 to vector<8x32xf32>
    %277 = arith.subf %275, %276 : vector<8x32xf32>
    %278 = vector.extract_strided_slice %270 {offsets = [0, 96], sizes = [8, 32], strides = [1, 1]} : vector<8x128xf32> to vector<8x32xf32>
    %279 = arith.mulf %272, %237 : vector<8x32xf32>
    %280 = arith.mulf %271, %277 : vector<8x32xf32>
    %281 = arith.addf %279, %280 : vector<8x32xf32>
    %282 = math.tanh %281 : vector<8x32xf32>
    %283 = arith.mulf %278, %282 : vector<8x32xf32>
    %cst_86 = arith.constant dense<0.000000e+00> : vector<8x128xf32>
    %284 = tpu.matmul %239, %3, %cst_86 {dimension_numbers = #tpu.dot_dimension_numbers<[1], [0], [0], [1], [0, 0, 1, 1], [], []>} : vector<8x32xf32>, vector<32x128xf32>, vector<8x128xf32> -> vector<8x128xf32>
    %cst_87 = arith.constant dense<0.000000e+00> : vector<8x128xf32>
    %285 = tpu.matmul %262, %4, %cst_87 {dimension_numbers = #tpu.dot_dimension_numbers<[1], [0], [0], [1], [0, 0, 1, 1], [], []>} : vector<8x32xf32>, vector<32x128xf32>, vector<8x128xf32> -> vector<8x128xf32>
    %286 = arith.addf %284, %285 : vector<8x128xf32>
    %287 = vector.broadcast %5 : vector<1x128xf32> to vector<8x128xf32>
    %288 = arith.addf %286, %287 : vector<8x128xf32>
    %289 = arith.negf %288 : vector<8x128xf32>
    %290 = math.exp %289 : vector<8x128xf32>
    %cst_88 = arith.constant 1.000000e+00 : f32
    %291 = vector.broadcast %cst_88 : f32 to vector<8x128xf32>
    %292 = arith.addf %291, %290 : vector<8x128xf32>
    %293 = arith.divf %291, %292 : vector<8x128xf32>
    %294 = vector.extract_strided_slice %293 {offsets = [0, 0], sizes = [8, 32], strides = [1, 1]} : vector<8x128xf32> to vector<8x32xf32>
    %295 = vector.extract_strided_slice %293 {offsets = [0, 32], sizes = [8, 32], strides = [1, 1]} : vector<8x128xf32> to vector<8x32xf32>
    %296 = vector.extract_strided_slice %293 {offsets = [0, 64], sizes = [8, 32], strides = [1, 1]} : vector<8x128xf32> to vector<8x32xf32>
    %cst_89 = arith.constant 2.000000e+00 : f32
    %297 = vector.broadcast %cst_89 : f32 to vector<8x32xf32>
    %298 = arith.mulf %297, %296 : vector<8x32xf32>
    %cst_90 = arith.constant 1.000000e+00 : f32
    %299 = vector.broadcast %cst_90 : f32 to vector<8x32xf32>
    %300 = arith.subf %298, %299 : vector<8x32xf32>
    %301 = vector.extract_strided_slice %293 {offsets = [0, 96], sizes = [8, 32], strides = [1, 1]} : vector<8x128xf32> to vector<8x32xf32>
    %302 = arith.mulf %295, %260 : vector<8x32xf32>
    %303 = arith.mulf %294, %300 : vector<8x32xf32>
    %304 = arith.addf %302, %303 : vector<8x32xf32>
    %305 = math.tanh %304 : vector<8x32xf32>
    %306 = arith.mulf %301, %305 : vector<8x32xf32>
    %307 = vector.extract_strided_slice %17 {offsets = [56, 0], sizes = [8, 128], strides = [1, 1]} : vector<64x128xf32> to vector<8x128xf32>
    %cst_91 = arith.constant dense<0.000000e+00> : vector<8x128xf32>
    %308 = tpu.matmul %283, %1, %cst_91 {dimension_numbers = #tpu.dot_dimension_numbers<[1], [0], [0], [1], [0, 0, 1, 1], [], []>} : vector<8x32xf32>, vector<32x128xf32>, vector<8x128xf32> -> vector<8x128xf32>
    %309 = arith.addf %307, %308 : vector<8x128xf32>
    %310 = arith.negf %309 : vector<8x128xf32>
    %311 = math.exp %310 : vector<8x128xf32>
    %cst_92 = arith.constant 1.000000e+00 : f32
    %312 = vector.broadcast %cst_92 : f32 to vector<8x128xf32>
    %313 = arith.addf %312, %311 : vector<8x128xf32>
    %314 = arith.divf %312, %313 : vector<8x128xf32>
    %315 = vector.extract_strided_slice %314 {offsets = [0, 0], sizes = [8, 32], strides = [1, 1]} : vector<8x128xf32> to vector<8x32xf32>
    %316 = vector.extract_strided_slice %314 {offsets = [0, 32], sizes = [8, 32], strides = [1, 1]} : vector<8x128xf32> to vector<8x32xf32>
    %317 = vector.extract_strided_slice %314 {offsets = [0, 64], sizes = [8, 32], strides = [1, 1]} : vector<8x128xf32> to vector<8x32xf32>
    %cst_93 = arith.constant 2.000000e+00 : f32
    %318 = vector.broadcast %cst_93 : f32 to vector<8x32xf32>
    %319 = arith.mulf %318, %317 : vector<8x32xf32>
    %cst_94 = arith.constant 1.000000e+00 : f32
    %320 = vector.broadcast %cst_94 : f32 to vector<8x32xf32>
    %321 = arith.subf %319, %320 : vector<8x32xf32>
    %322 = vector.extract_strided_slice %314 {offsets = [0, 96], sizes = [8, 32], strides = [1, 1]} : vector<8x128xf32> to vector<8x32xf32>
    %323 = arith.mulf %316, %281 : vector<8x32xf32>
    %324 = arith.mulf %315, %321 : vector<8x32xf32>
    %325 = arith.addf %323, %324 : vector<8x32xf32>
    %326 = math.tanh %325 : vector<8x32xf32>
    %327 = arith.mulf %322, %326 : vector<8x32xf32>
    %cst_95 = arith.constant dense<0.000000e+00> : vector<8x128xf32>
    %328 = tpu.matmul %283, %3, %cst_95 {dimension_numbers = #tpu.dot_dimension_numbers<[1], [0], [0], [1], [0, 0, 1, 1], [], []>} : vector<8x32xf32>, vector<32x128xf32>, vector<8x128xf32> -> vector<8x128xf32>
    %cst_96 = arith.constant dense<0.000000e+00> : vector<8x128xf32>
    %329 = tpu.matmul %306, %4, %cst_96 {dimension_numbers = #tpu.dot_dimension_numbers<[1], [0], [0], [1], [0, 0, 1, 1], [], []>} : vector<8x32xf32>, vector<32x128xf32>, vector<8x128xf32> -> vector<8x128xf32>
    %330 = arith.addf %328, %329 : vector<8x128xf32>
    %331 = vector.broadcast %5 : vector<1x128xf32> to vector<8x128xf32>
    %332 = arith.addf %330, %331 : vector<8x128xf32>
    %333 = arith.negf %332 : vector<8x128xf32>
    %334 = math.exp %333 : vector<8x128xf32>
    %cst_97 = arith.constant 1.000000e+00 : f32
    %335 = vector.broadcast %cst_97 : f32 to vector<8x128xf32>
    %336 = arith.addf %335, %334 : vector<8x128xf32>
    %337 = arith.divf %335, %336 : vector<8x128xf32>
    %338 = vector.extract_strided_slice %337 {offsets = [0, 0], sizes = [8, 32], strides = [1, 1]} : vector<8x128xf32> to vector<8x32xf32>
    %339 = vector.extract_strided_slice %337 {offsets = [0, 32], sizes = [8, 32], strides = [1, 1]} : vector<8x128xf32> to vector<8x32xf32>
    %340 = vector.extract_strided_slice %337 {offsets = [0, 64], sizes = [8, 32], strides = [1, 1]} : vector<8x128xf32> to vector<8x32xf32>
    %cst_98 = arith.constant 2.000000e+00 : f32
    %341 = vector.broadcast %cst_98 : f32 to vector<8x32xf32>
    %342 = arith.mulf %341, %340 : vector<8x32xf32>
    %cst_99 = arith.constant 1.000000e+00 : f32
    %343 = vector.broadcast %cst_99 : f32 to vector<8x32xf32>
    %344 = arith.subf %342, %343 : vector<8x32xf32>
    %345 = vector.extract_strided_slice %337 {offsets = [0, 96], sizes = [8, 32], strides = [1, 1]} : vector<8x128xf32> to vector<8x32xf32>
    %346 = arith.mulf %339, %304 : vector<8x32xf32>
    %347 = arith.mulf %338, %344 : vector<8x32xf32>
    %348 = arith.addf %346, %347 : vector<8x32xf32>
    %349 = math.tanh %348 : vector<8x32xf32>
    %350 = arith.mulf %345, %349 : vector<8x32xf32>
    %cst_100 = arith.constant dense<0.000000e+00> : vector<8x128xf32>
    %351 = tpu.matmul %327, %3, %cst_100 {dimension_numbers = #tpu.dot_dimension_numbers<[1], [0], [0], [1], [0, 0, 1, 1], [], []>} : vector<8x32xf32>, vector<32x128xf32>, vector<8x128xf32> -> vector<8x128xf32>
    %cst_101 = arith.constant dense<0.000000e+00> : vector<8x128xf32>
    %352 = tpu.matmul %350, %4, %cst_101 {dimension_numbers = #tpu.dot_dimension_numbers<[1], [0], [0], [1], [0, 0, 1, 1], [], []>} : vector<8x32xf32>, vector<32x128xf32>, vector<8x128xf32> -> vector<8x128xf32>
    %353 = arith.addf %351, %352 : vector<8x128xf32>
    %354 = vector.broadcast %5 : vector<1x128xf32> to vector<8x128xf32>
    %355 = arith.addf %353, %354 : vector<8x128xf32>
    %356 = arith.negf %355 : vector<8x128xf32>
    %357 = math.exp %356 : vector<8x128xf32>
    %cst_102 = arith.constant 1.000000e+00 : f32
    %358 = vector.broadcast %cst_102 : f32 to vector<8x128xf32>
    %359 = arith.addf %358, %357 : vector<8x128xf32>
    %360 = arith.divf %358, %359 : vector<8x128xf32>
    %361 = vector.extract_strided_slice %360 {offsets = [0, 0], sizes = [8, 32], strides = [1, 1]} : vector<8x128xf32> to vector<8x32xf32>
    %362 = vector.extract_strided_slice %360 {offsets = [0, 32], sizes = [8, 32], strides = [1, 1]} : vector<8x128xf32> to vector<8x32xf32>
    %363 = vector.extract_strided_slice %360 {offsets = [0, 64], sizes = [8, 32], strides = [1, 1]} : vector<8x128xf32> to vector<8x32xf32>
    %cst_103 = arith.constant 2.000000e+00 : f32
    %364 = vector.broadcast %cst_103 : f32 to vector<8x32xf32>
    %365 = arith.mulf %364, %363 : vector<8x32xf32>
    %cst_104 = arith.constant 1.000000e+00 : f32
    %366 = vector.broadcast %cst_104 : f32 to vector<8x32xf32>
    %367 = arith.subf %365, %366 : vector<8x32xf32>
    %368 = vector.extract_strided_slice %360 {offsets = [0, 96], sizes = [8, 32], strides = [1, 1]} : vector<8x128xf32> to vector<8x32xf32>
    %369 = arith.mulf %362, %348 : vector<8x32xf32>
    %370 = arith.mulf %361, %367 : vector<8x32xf32>
    %371 = arith.addf %369, %370 : vector<8x32xf32>
    %372 = math.tanh %371 : vector<8x32xf32>
    %373 = arith.mulf %368, %372 : vector<8x32xf32>
    %cst_105 = arith.constant dense<0.000000e+00> : vector<8x128xf32>
    %374 = tpu.matmul %373, %6, %cst_105 {dimension_numbers = #tpu.dot_dimension_numbers<[1], [0], [0], [1], [0, 0, 1, 1], [], []>} : vector<8x32xf32>, vector<32x128xf32>, vector<8x128xf32> -> vector<8x128xf32>
    %375 = vector.broadcast %8 : vector<1x128xf32> to vector<8x128xf32>
    %376 = arith.addf %374, %375 : vector<8x128xf32>
    %cst_106 = arith.constant 0.000000e+00 : f32
    %377 = vector.broadcast %cst_106 : f32 to vector<2x32xf32>
    %cst_107 = arith.constant 0.000000e+00 : f32
    %378 = vector.broadcast %cst_107 : f32 to vector<2x32xf32>
    %cst_108 = arith.constant 0.000000e+00 : f32
    %379 = vector.broadcast %cst_108 : f32 to vector<2x32xf32>
    %cst_109 = arith.constant 0.000000e+00 : f32
    %380 = vector.broadcast %cst_109 : f32 to vector<2x32xf32>
    %381 = vector.extract_strided_slice %376 {offsets = [0, 0], sizes = [2, 128], strides = [1, 1]} : vector<8x128xf32> to vector<2x128xf32>
    %cst_110 = arith.constant dense<0.000000e+00> : vector<2x128xf32>
    %382 = tpu.matmul %377, %7, %cst_110 {dimension_numbers = #tpu.dot_dimension_numbers<[1], [0], [0], [1], [0, 0, 1, 1], [], []>} : vector<2x32xf32>, vector<32x128xf32>, vector<2x128xf32> -> vector<2x128xf32>
    %383 = arith.addf %381, %382 : vector<2x128xf32>
    %384 = arith.negf %383 : vector<2x128xf32>
    %385 = math.exp %384 : vector<2x128xf32>
    %cst_111 = arith.constant 1.000000e+00 : f32
    %386 = vector.broadcast %cst_111 : f32 to vector<2x128xf32>
    %387 = arith.addf %386, %385 : vector<2x128xf32>
    %388 = arith.divf %386, %387 : vector<2x128xf32>
    %389 = vector.extract_strided_slice %388 {offsets = [0, 0], sizes = [2, 32], strides = [1, 1]} : vector<2x128xf32> to vector<2x32xf32>
    %390 = vector.extract_strided_slice %388 {offsets = [0, 32], sizes = [2, 32], strides = [1, 1]} : vector<2x128xf32> to vector<2x32xf32>
    %391 = vector.extract_strided_slice %388 {offsets = [0, 64], sizes = [2, 32], strides = [1, 1]} : vector<2x128xf32> to vector<2x32xf32>
    %cst_112 = arith.constant 2.000000e+00 : f32
    %392 = vector.broadcast %cst_112 : f32 to vector<2x32xf32>
    %393 = arith.mulf %392, %391 : vector<2x32xf32>
    %cst_113 = arith.constant 1.000000e+00 : f32
    %394 = vector.broadcast %cst_113 : f32 to vector<2x32xf32>
    %395 = arith.subf %393, %394 : vector<2x32xf32>
    %396 = vector.extract_strided_slice %388 {offsets = [0, 96], sizes = [2, 32], strides = [1, 1]} : vector<2x128xf32> to vector<2x32xf32>
    %397 = arith.mulf %390, %379 : vector<2x32xf32>
    %398 = arith.mulf %389, %395 : vector<2x32xf32>
    %399 = arith.addf %397, %398 : vector<2x32xf32>
    %400 = math.tanh %399 : vector<2x32xf32>
    %401 = arith.mulf %396, %400 : vector<2x32xf32>
    %402 = vector.extract_strided_slice %376 {offsets = [2, 0], sizes = [2, 128], strides = [1, 1]} : vector<8x128xf32> to vector<2x128xf32>
    %cst_114 = arith.constant dense<0.000000e+00> : vector<2x128xf32>
    %403 = tpu.matmul %401, %7, %cst_114 {dimension_numbers = #tpu.dot_dimension_numbers<[1], [0], [0], [1], [0, 0, 1, 1], [], []>} : vector<2x32xf32>, vector<32x128xf32>, vector<2x128xf32> -> vector<2x128xf32>
    %404 = arith.addf %402, %403 : vector<2x128xf32>
    %405 = arith.negf %404 : vector<2x128xf32>
    %406 = math.exp %405 : vector<2x128xf32>
    %cst_115 = arith.constant 1.000000e+00 : f32
    %407 = vector.broadcast %cst_115 : f32 to vector<2x128xf32>
    %408 = arith.addf %407, %406 : vector<2x128xf32>
    %409 = arith.divf %407, %408 : vector<2x128xf32>
    %410 = vector.extract_strided_slice %409 {offsets = [0, 0], sizes = [2, 32], strides = [1, 1]} : vector<2x128xf32> to vector<2x32xf32>
    %411 = vector.extract_strided_slice %409 {offsets = [0, 32], sizes = [2, 32], strides = [1, 1]} : vector<2x128xf32> to vector<2x32xf32>
    %412 = vector.extract_strided_slice %409 {offsets = [0, 64], sizes = [2, 32], strides = [1, 1]} : vector<2x128xf32> to vector<2x32xf32>
    %cst_116 = arith.constant 2.000000e+00 : f32
    %413 = vector.broadcast %cst_116 : f32 to vector<2x32xf32>
    %414 = arith.mulf %413, %412 : vector<2x32xf32>
    %cst_117 = arith.constant 1.000000e+00 : f32
    %415 = vector.broadcast %cst_117 : f32 to vector<2x32xf32>
    %416 = arith.subf %414, %415 : vector<2x32xf32>
    %417 = vector.extract_strided_slice %409 {offsets = [0, 96], sizes = [2, 32], strides = [1, 1]} : vector<2x128xf32> to vector<2x32xf32>
    %418 = arith.mulf %411, %399 : vector<2x32xf32>
    %419 = arith.mulf %410, %416 : vector<2x32xf32>
    %420 = arith.addf %418, %419 : vector<2x32xf32>
    %421 = math.tanh %420 : vector<2x32xf32>
    %422 = arith.mulf %417, %421 : vector<2x32xf32>
    %cst_118 = arith.constant dense<0.000000e+00> : vector<2x128xf32>
    %423 = tpu.matmul %401, %9, %cst_118 {dimension_numbers = #tpu.dot_dimension_numbers<[1], [0], [0], [1], [0, 0, 1, 1], [], []>} : vector<2x32xf32>, vector<32x128xf32>, vector<2x128xf32> -> vector<2x128xf32>
    %cst_119 = arith.constant dense<0.000000e+00> : vector<2x128xf32>
    %424 = tpu.matmul %378, %10, %cst_119 {dimension_numbers = #tpu.dot_dimension_numbers<[1], [0], [0], [1], [0, 0, 1, 1], [], []>} : vector<2x32xf32>, vector<32x128xf32>, vector<2x128xf32> -> vector<2x128xf32>
    %425 = arith.addf %423, %424 : vector<2x128xf32>
    %426 = vector.broadcast %11 : vector<1x128xf32> to vector<2x128xf32>
    %427 = arith.addf %425, %426 : vector<2x128xf32>
    %428 = arith.negf %427 : vector<2x128xf32>
    %429 = math.exp %428 : vector<2x128xf32>
    %cst_120 = arith.constant 1.000000e+00 : f32
    %430 = vector.broadcast %cst_120 : f32 to vector<2x128xf32>
    %431 = arith.addf %430, %429 : vector<2x128xf32>
    %432 = arith.divf %430, %431 : vector<2x128xf32>
    %433 = vector.extract_strided_slice %432 {offsets = [0, 0], sizes = [2, 32], strides = [1, 1]} : vector<2x128xf32> to vector<2x32xf32>
    %434 = vector.extract_strided_slice %432 {offsets = [0, 32], sizes = [2, 32], strides = [1, 1]} : vector<2x128xf32> to vector<2x32xf32>
    %435 = vector.extract_strided_slice %432 {offsets = [0, 64], sizes = [2, 32], strides = [1, 1]} : vector<2x128xf32> to vector<2x32xf32>
    %cst_121 = arith.constant 2.000000e+00 : f32
    %436 = vector.broadcast %cst_121 : f32 to vector<2x32xf32>
    %437 = arith.mulf %436, %435 : vector<2x32xf32>
    %cst_122 = arith.constant 1.000000e+00 : f32
    %438 = vector.broadcast %cst_122 : f32 to vector<2x32xf32>
    %439 = arith.subf %437, %438 : vector<2x32xf32>
    %440 = vector.extract_strided_slice %432 {offsets = [0, 96], sizes = [2, 32], strides = [1, 1]} : vector<2x128xf32> to vector<2x32xf32>
    %441 = arith.mulf %434, %380 : vector<2x32xf32>
    %442 = arith.mulf %433, %439 : vector<2x32xf32>
    %443 = arith.addf %441, %442 : vector<2x32xf32>
    %444 = math.tanh %443 : vector<2x32xf32>
    %445 = arith.mulf %440, %444 : vector<2x32xf32>
    %446 = vector.extract_strided_slice %376 {offsets = [4, 0], sizes = [2, 128], strides = [1, 1]} : vector<8x128xf32> to vector<2x128xf32>
    %cst_123 = arith.constant dense<0.000000e+00> : vector<2x128xf32>
    %447 = tpu.matmul %422, %7, %cst_123 {dimension_numbers = #tpu.dot_dimension_numbers<[1], [0], [0], [1], [0, 0, 1, 1], [], []>} : vector<2x32xf32>, vector<32x128xf32>, vector<2x128xf32> -> vector<2x128xf32>
    %448 = arith.addf %446, %447 : vector<2x128xf32>
    %449 = arith.negf %448 : vector<2x128xf32>
    %450 = math.exp %449 : vector<2x128xf32>
    %cst_124 = arith.constant 1.000000e+00 : f32
    %451 = vector.broadcast %cst_124 : f32 to vector<2x128xf32>
    %452 = arith.addf %451, %450 : vector<2x128xf32>
    %453 = arith.divf %451, %452 : vector<2x128xf32>
    %454 = vector.extract_strided_slice %453 {offsets = [0, 0], sizes = [2, 32], strides = [1, 1]} : vector<2x128xf32> to vector<2x32xf32>
    %455 = vector.extract_strided_slice %453 {offsets = [0, 32], sizes = [2, 32], strides = [1, 1]} : vector<2x128xf32> to vector<2x32xf32>
    %456 = vector.extract_strided_slice %453 {offsets = [0, 64], sizes = [2, 32], strides = [1, 1]} : vector<2x128xf32> to vector<2x32xf32>
    %cst_125 = arith.constant 2.000000e+00 : f32
    %457 = vector.broadcast %cst_125 : f32 to vector<2x32xf32>
    %458 = arith.mulf %457, %456 : vector<2x32xf32>
    %cst_126 = arith.constant 1.000000e+00 : f32
    %459 = vector.broadcast %cst_126 : f32 to vector<2x32xf32>
    %460 = arith.subf %458, %459 : vector<2x32xf32>
    %461 = vector.extract_strided_slice %453 {offsets = [0, 96], sizes = [2, 32], strides = [1, 1]} : vector<2x128xf32> to vector<2x32xf32>
    %462 = arith.mulf %455, %420 : vector<2x32xf32>
    %463 = arith.mulf %454, %460 : vector<2x32xf32>
    %464 = arith.addf %462, %463 : vector<2x32xf32>
    %465 = math.tanh %464 : vector<2x32xf32>
    %466 = arith.mulf %461, %465 : vector<2x32xf32>
    %cst_127 = arith.constant dense<0.000000e+00> : vector<2x128xf32>
    %467 = tpu.matmul %422, %9, %cst_127 {dimension_numbers = #tpu.dot_dimension_numbers<[1], [0], [0], [1], [0, 0, 1, 1], [], []>} : vector<2x32xf32>, vector<32x128xf32>, vector<2x128xf32> -> vector<2x128xf32>
    %cst_128 = arith.constant dense<0.000000e+00> : vector<2x128xf32>
    %468 = tpu.matmul %445, %10, %cst_128 {dimension_numbers = #tpu.dot_dimension_numbers<[1], [0], [0], [1], [0, 0, 1, 1], [], []>} : vector<2x32xf32>, vector<32x128xf32>, vector<2x128xf32> -> vector<2x128xf32>
    %469 = arith.addf %467, %468 : vector<2x128xf32>
    %470 = vector.broadcast %11 : vector<1x128xf32> to vector<2x128xf32>
    %471 = arith.addf %469, %470 : vector<2x128xf32>
    %472 = arith.negf %471 : vector<2x128xf32>
    %473 = math.exp %472 : vector<2x128xf32>
    %cst_129 = arith.constant 1.000000e+00 : f32
    %474 = vector.broadcast %cst_129 : f32 to vector<2x128xf32>
    %475 = arith.addf %474, %473 : vector<2x128xf32>
    %476 = arith.divf %474, %475 : vector<2x128xf32>
    %477 = vector.extract_strided_slice %476 {offsets = [0, 0], sizes = [2, 32], strides = [1, 1]} : vector<2x128xf32> to vector<2x32xf32>
    %478 = vector.extract_strided_slice %476 {offsets = [0, 32], sizes = [2, 32], strides = [1, 1]} : vector<2x128xf32> to vector<2x32xf32>
    %479 = vector.extract_strided_slice %476 {offsets = [0, 64], sizes = [2, 32], strides = [1, 1]} : vector<2x128xf32> to vector<2x32xf32>
    %cst_130 = arith.constant 2.000000e+00 : f32
    %480 = vector.broadcast %cst_130 : f32 to vector<2x32xf32>
    %481 = arith.mulf %480, %479 : vector<2x32xf32>
    %cst_131 = arith.constant 1.000000e+00 : f32
    %482 = vector.broadcast %cst_131 : f32 to vector<2x32xf32>
    %483 = arith.subf %481, %482 : vector<2x32xf32>
    %484 = vector.extract_strided_slice %476 {offsets = [0, 96], sizes = [2, 32], strides = [1, 1]} : vector<2x128xf32> to vector<2x32xf32>
    %485 = arith.mulf %478, %443 : vector<2x32xf32>
    %486 = arith.mulf %477, %483 : vector<2x32xf32>
    %487 = arith.addf %485, %486 : vector<2x32xf32>
    %488 = math.tanh %487 : vector<2x32xf32>
    %489 = arith.mulf %484, %488 : vector<2x32xf32>
    %490 = vector.extract_strided_slice %376 {offsets = [6, 0], sizes = [2, 128], strides = [1, 1]} : vector<8x128xf32> to vector<2x128xf32>
    %cst_132 = arith.constant dense<0.000000e+00> : vector<2x128xf32>
    %491 = tpu.matmul %466, %7, %cst_132 {dimension_numbers = #tpu.dot_dimension_numbers<[1], [0], [0], [1], [0, 0, 1, 1], [], []>} : vector<2x32xf32>, vector<32x128xf32>, vector<2x128xf32> -> vector<2x128xf32>
    %492 = arith.addf %490, %491 : vector<2x128xf32>
    %493 = arith.negf %492 : vector<2x128xf32>
    %494 = math.exp %493 : vector<2x128xf32>
    %cst_133 = arith.constant 1.000000e+00 : f32
    %495 = vector.broadcast %cst_133 : f32 to vector<2x128xf32>
    %496 = arith.addf %495, %494 : vector<2x128xf32>
    %497 = arith.divf %495, %496 : vector<2x128xf32>
    %498 = vector.extract_strided_slice %497 {offsets = [0, 0], sizes = [2, 32], strides = [1, 1]} : vector<2x128xf32> to vector<2x32xf32>
    %499 = vector.extract_strided_slice %497 {offsets = [0, 32], sizes = [2, 32], strides = [1, 1]} : vector<2x128xf32> to vector<2x32xf32>
    %500 = vector.extract_strided_slice %497 {offsets = [0, 64], sizes = [2, 32], strides = [1, 1]} : vector<2x128xf32> to vector<2x32xf32>
    %cst_134 = arith.constant 2.000000e+00 : f32
    %501 = vector.broadcast %cst_134 : f32 to vector<2x32xf32>
    %502 = arith.mulf %501, %500 : vector<2x32xf32>
    %cst_135 = arith.constant 1.000000e+00 : f32
    %503 = vector.broadcast %cst_135 : f32 to vector<2x32xf32>
    %504 = arith.subf %502, %503 : vector<2x32xf32>
    %505 = vector.extract_strided_slice %497 {offsets = [0, 96], sizes = [2, 32], strides = [1, 1]} : vector<2x128xf32> to vector<2x32xf32>
    %506 = arith.mulf %499, %464 : vector<2x32xf32>
    %507 = arith.mulf %498, %504 : vector<2x32xf32>
    %508 = arith.addf %506, %507 : vector<2x32xf32>
    %509 = math.tanh %508 : vector<2x32xf32>
    %510 = arith.mulf %505, %509 : vector<2x32xf32>
    %cst_136 = arith.constant dense<0.000000e+00> : vector<2x128xf32>
    %511 = tpu.matmul %466, %9, %cst_136 {dimension_numbers = #tpu.dot_dimension_numbers<[1], [0], [0], [1], [0, 0, 1, 1], [], []>} : vector<2x32xf32>, vector<32x128xf32>, vector<2x128xf32> -> vector<2x128xf32>
    %cst_137 = arith.constant dense<0.000000e+00> : vector<2x128xf32>
    %512 = tpu.matmul %489, %10, %cst_137 {dimension_numbers = #tpu.dot_dimension_numbers<[1], [0], [0], [1], [0, 0, 1, 1], [], []>} : vector<2x32xf32>, vector<32x128xf32>, vector<2x128xf32> -> vector<2x128xf32>
    %513 = arith.addf %511, %512 : vector<2x128xf32>
    %514 = vector.broadcast %11 : vector<1x128xf32> to vector<2x128xf32>
    %515 = arith.addf %513, %514 : vector<2x128xf32>
    %516 = arith.negf %515 : vector<2x128xf32>
    %517 = math.exp %516 : vector<2x128xf32>
    %cst_138 = arith.constant 1.000000e+00 : f32
    %518 = vector.broadcast %cst_138 : f32 to vector<2x128xf32>
    %519 = arith.addf %518, %517 : vector<2x128xf32>
    %520 = arith.divf %518, %519 : vector<2x128xf32>
    %521 = vector.extract_strided_slice %520 {offsets = [0, 0], sizes = [2, 32], strides = [1, 1]} : vector<2x128xf32> to vector<2x32xf32>
    %522 = vector.extract_strided_slice %520 {offsets = [0, 32], sizes = [2, 32], strides = [1, 1]} : vector<2x128xf32> to vector<2x32xf32>
    %523 = vector.extract_strided_slice %520 {offsets = [0, 64], sizes = [2, 32], strides = [1, 1]} : vector<2x128xf32> to vector<2x32xf32>
    %cst_139 = arith.constant 2.000000e+00 : f32
    %524 = vector.broadcast %cst_139 : f32 to vector<2x32xf32>
    %525 = arith.mulf %524, %523 : vector<2x32xf32>
    %cst_140 = arith.constant 1.000000e+00 : f32
    %526 = vector.broadcast %cst_140 : f32 to vector<2x32xf32>
    %527 = arith.subf %525, %526 : vector<2x32xf32>
    %528 = vector.extract_strided_slice %520 {offsets = [0, 96], sizes = [2, 32], strides = [1, 1]} : vector<2x128xf32> to vector<2x32xf32>
    %529 = arith.mulf %522, %487 : vector<2x32xf32>
    %530 = arith.mulf %521, %527 : vector<2x32xf32>
    %531 = arith.addf %529, %530 : vector<2x32xf32>
    %532 = math.tanh %531 : vector<2x32xf32>
    %533 = arith.mulf %528, %532 : vector<2x32xf32>
    %cst_141 = arith.constant dense<0.000000e+00> : vector<2x128xf32>
    %534 = tpu.matmul %510, %9, %cst_141 {dimension_numbers = #tpu.dot_dimension_numbers<[1], [0], [0], [1], [0, 0, 1, 1], [], []>} : vector<2x32xf32>, vector<32x128xf32>, vector<2x128xf32> -> vector<2x128xf32>
    %cst_142 = arith.constant dense<0.000000e+00> : vector<2x128xf32>
    %535 = tpu.matmul %533, %10, %cst_142 {dimension_numbers = #tpu.dot_dimension_numbers<[1], [0], [0], [1], [0, 0, 1, 1], [], []>} : vector<2x32xf32>, vector<32x128xf32>, vector<2x128xf32> -> vector<2x128xf32>
    %536 = arith.addf %534, %535 : vector<2x128xf32>
    %537 = vector.broadcast %11 : vector<1x128xf32> to vector<2x128xf32>
    %538 = arith.addf %536, %537 : vector<2x128xf32>
    %539 = arith.negf %538 : vector<2x128xf32>
    %540 = math.exp %539 : vector<2x128xf32>
    %cst_143 = arith.constant 1.000000e+00 : f32
    %541 = vector.broadcast %cst_143 : f32 to vector<2x128xf32>
    %542 = arith.addf %541, %540 : vector<2x128xf32>
    %543 = arith.divf %541, %542 : vector<2x128xf32>
    %544 = vector.extract_strided_slice %543 {offsets = [0, 0], sizes = [2, 32], strides = [1, 1]} : vector<2x128xf32> to vector<2x32xf32>
    %545 = vector.extract_strided_slice %543 {offsets = [0, 32], sizes = [2, 32], strides = [1, 1]} : vector<2x128xf32> to vector<2x32xf32>
    %546 = vector.extract_strided_slice %543 {offsets = [0, 64], sizes = [2, 32], strides = [1, 1]} : vector<2x128xf32> to vector<2x32xf32>
    %cst_144 = arith.constant 2.000000e+00 : f32
    %547 = vector.broadcast %cst_144 : f32 to vector<2x32xf32>
    %548 = arith.mulf %547, %546 : vector<2x32xf32>
    %cst_145 = arith.constant 1.000000e+00 : f32
    %549 = vector.broadcast %cst_145 : f32 to vector<2x32xf32>
    %550 = arith.subf %548, %549 : vector<2x32xf32>
    %551 = vector.extract_strided_slice %543 {offsets = [0, 96], sizes = [2, 32], strides = [1, 1]} : vector<2x128xf32> to vector<2x32xf32>
    %552 = arith.mulf %545, %531 : vector<2x32xf32>
    %553 = arith.mulf %544, %550 : vector<2x32xf32>
    %554 = arith.addf %552, %553 : vector<2x32xf32>
    %555 = math.tanh %554 : vector<2x32xf32>
    %556 = arith.mulf %551, %555 : vector<2x32xf32>
    %cst_146 = arith.constant dense<0.000000e+00> : vector<2x1xf32>
    %557 = tpu.matmul %556, %12, %cst_146 {dimension_numbers = #tpu.dot_dimension_numbers<[1], [0], [0], [1], [0, 0, 1, 1], [], []>} : vector<2x32xf32>, vector<32x1xf32>, vector<2x1xf32> -> vector<2x1xf32>
    %558 = vector.broadcast %13 : vector<1x1xf32> to vector<2x1xf32>
    %559 = arith.addf %557, %558 : vector<2x1xf32>
    %560 = arith.negf %559 : vector<2x1xf32>
    %561 = math.exp %560 : vector<2x1xf32>
    %cst_147 = arith.constant 1.000000e+00 : f32
    %562 = vector.broadcast %cst_147 : f32 to vector<2x1xf32>
    %563 = arith.addf %562, %561 : vector<2x1xf32>
    %564 = arith.divf %562, %563 : vector<2x1xf32>
    %c0_148 = arith.constant 0 : index
    %c0_149 = arith.constant 0 : index
    %565 = vector.load %arg15[%c0_148, %c0_149] : memref<2x1xf32, #tpu.memory_space<vmem>>, vector<2x1xf32>
    tpu.vector_store %arg15[%c0_148, %c0_149], %564 {strides = array<i32>} : memref<2x1xf32, #tpu.memory_space<vmem>>, vector<2x1xf32>,
    return
  }
}

</mosaic_0001>

<bundles_post_ra>
// kernel: model_forward.1
= control target key start
LH: loop header
LB: loop body
LE: loop exit
PB: predicated region body
PF: predicated region fallthrough
CT: control target
= control target key end

     0   :  { %vm129_vm0 = vcmask 1043456   ;;  %vm104_vm1 = vcmask 31744   ;;  %v4813_v0 = vmov 0.0|0.0   ;;  %vm4814_vm2 = vmmov 0   ;;  %s4816_s17 = smov 64   ;;  %s4817_s18 = smov 32   ;;  %s5558_s2 = inlined_call_operand.vmem [shape: f32[32,128], index: 2, kind: input, shape index: {}]   ;;  %s5559_s1 = inlined_call_operand.vmem [shape: f32[4,128], index: 1, kind: input, shape index: {}]   ;;  %s5560_s0 = inlined_call_operand.vmem [shape: f32[64,4], index: 0, kind: input, shape index: {}]   ;;  %s5561_s3 = inlined_call_operand.vmem [shape: f32[1,128], index: 3, kind: input, shape index: {}]   ;;  %s5562_s5 = inlined_call_operand.vmem [shape: f32[32,128], index: 5, kind: input, shape index: {}]   ;;  %s5563_s4 = inlined_call_operand.vmem [shape: f32[32,128], index: 4, kind: input, shape index: {}]   ;;  %s5564_s6 = inlined_call_operand.vmem [shape: f32[1,128], index: 6, kind: input, shape index: {}]   ;;  %s5565_s7 = inlined_call_operand.vmem [shape: f32[32,128], index: 7, kind: input, shape index: {}]   ;;  %s5566_s8 = inlined_call_operand.vmem [shape: f32[32,128], index: 8, kind: input, shape index: {}]   ;;  %s5567_s9 = inlined_call_operand.vmem [shape: f32[1,128], index: 9, kind: input, shape index: {}]   ;;  %s5568_s11 = inlined_call_operand.vmem [shape: f32[32,128], index: 11, kind: input, shape index: {}]   ;;  %s5569_s10 = inlined_call_operand.vmem [shape: f32[32,128], index: 10, kind: input, shape index: {}]   ;;  %s5570_s12 = inlined_call_operand.vmem [shape: f32[1,128], index: 12, kind: input, shape index: {}]   ;;  %s5571_s13 = inlined_call_operand.vmem [shape: f32[32,1], index: 13, kind: input, shape index: {}]   ;;  %s5572_s14 = inlined_call_operand.<no memory space> [shape: f32[1,1], index: 14, kind: input, shape index: {}]   ;;  %s5573_s15 = inlined_call_operand.vmem [shape: f32[2,1], index: 15, kind: output, shape index: {}]  }
   0x1   :  { %4431 = vmatprep.subr.bf16.mxu1 %v4813_v0  ;;  %v53_v1 = vld [vmem:[%s5558_s2] sm:$0xff]  ;;  %v54_v2 = vld [vmem:[%s5558_s2 + $0x8] sm:$0xff]  ;;  %v55_v7 = vld [vmem:[%s5558_s2 + $0x10] sm:$0xff]  ;;  %v4815_v8 = vmov 0.0   ;;  %vm238_vm3 = vcmask 261120   ;;  %vm3697_vm4 = vcmask 1024  }
   0x2   :  { %v52_v3 = vld [vmem:[%s5559_s1] sm:$0xf]  ;;  %v4908_v4 = vpack.c.bf16 %v54_v2, %v53_v1  ;;  %v91_v6 = vld [vmem:[%s5560_s0 + $0x8] sm:$0xff]  ;;  %4021 = vmatprep.mubr.msk.f32.mxu1 %vm4814_vm2, %v4815_v8  ;;  %v56_v9 = vld [vmem:[%s5558_s2 + $0x18] sm:$0xff] }
   0x3   :  { %3999 = vmatprep.subr.msk.mxu0 %vm129_vm0, %v52_v3  ;;  %v90_v5 = vld [vmem:[%s5560_s0] sm:$0xff]  ;;  %v4929_v10 = vpack.c.bf16 %v56_v9, %v55_v7  ;;  %v92_v29 = vld [vmem:[%s5560_s0 + $0x10] sm:$0xff]  ;;  %v93_v30 = vld [vmem:[%s5560_s0 + $0x18] sm:$0xff] }
   0x4   :  { %4000 = vmatpush3.msk.msra.mxu0 %vm129_vm0, %v52_v3  ;;  %4001 = vmatprep.mubr.msk.f32.mxu0 %vm104_vm1, %v90_v5  ;;  %v4947_v12 = vld [vmem:[%s5561_s3] ss:$0 sm:$0xff]  ;;  %v63_v33 = vld [vmem:[%s5562_s5 + $0x8] sm:$0xff]  ;;  %v64_v35 = vld [vmem:[%s5562_s5 + $0x10] sm:$0xff] }
   0x5   :  { %4433 = vmatpush3.bf16.msra.mxu1 %v4908_v4  ;;  %4002 = vmatmul.mubr.msk.f32.vlgmr.msra.gmra.mrb[0].mxu0 %vm104_vm1, %v91_v6  ;;  %v94_v31 = vld [vmem:[%s5560_s0 + $0x20] sm:$0xff]  ;;  %v65_v36 = vld [vmem:[%s5562_s5 + $0x18] sm:$0xff]  ;;  %v95_v37 = vld [vmem:[%s5560_s0 + $0x28] sm:$0xff] }
   0x6   :  { %4434 = vmatprep.subr.bf16.mxu1 %v4813_v0  ;;  %4443 = vmatprep.subr.bf16.mxu0 %v4813_v0  ;;  %v62_v32 = vld [vmem:[%s5562_s5] sm:$0xff]  ;;  %v4985_v38 = vpack.c.bf16 %v65_v36, %v64_v35  ;;  %v96_v40 = vld [vmem:[%s5560_s0 + $0x30] sm:$0xff]  ;;  %v97_v41 = vld [vmem:[%s5560_s0 + $0x38] sm:$0xff] }
   0x7   :  { %4004 = vmatprep.mubr.msk.f32.mxu0 %vm104_vm1, %v92_v29  ;;  %v4971_v34 = vpack.c.bf16 %v63_v33, %v62_v32  ;;  %v58_v48 = vld [vmem:[%s5563_s4] sm:$0xff]  ;;  %v59_v49 = vld [vmem:[%s5563_s4 + $0x8] sm:$0xff]  ;;  %v60_v51 = vld [vmem:[%s5563_s4 + $0x10] sm:$0xff] }
   0x8   :  { %v5024_v50 = vpack.c.bf16 %v59_v49, %v58_v48  ;;  %v61_v52 = vld [vmem:[%s5563_s4 + $0x18] sm:$0xff]  ;;  %v5057_v1 = vld [vmem:[%s5564_s6] ss:$0 sm:$0xff] }
   0x9   :  { %4436 = vmatpush3.bf16.msra.mxu1 %v4929_v10  ;;  %4005 = vmatmul.mubr.msk.f32.gmra.mrb[2].mxu0 %vm104_vm1, %v93_v30  ;;  %v5034_v54 = vpack.c.bf16 %v61_v52, %v60_v51 }
   0xa   :  { %4437 = vmatprep.subr.bf16.mxu1 %v4813_v0  ;;  %4007 = vmatprep.mubr.msk.f32.mxu0 %vm104_vm1, %v94_v31 }
   0xb   :  { %4445 = vmatpush3.bf16.msra.mxu0 %v4971_v34 }
   0xc   :  { %4022 = vmatmul.mubr.f32.vlgmr.msra.gmra.mrb[0].mxu1 %v4815_v8  ;;  %4446 = vmatprep.subr.bf16.mxu0 %v4813_v0 }
   0xd   :  { %4439 = vmatpush3.bf16.msra.mxu1 %v4908_v4  ;;  %4032 = vmatprep.mubr.msk.f32.mxu1 %vm4814_vm2, %v4815_v8 }
   0xe   :  { %4440 = vmatprep.subr.bf16.mxu1 %v4813_v0  ;;  %4008 = vmatmul.mubr.msk.f32.gmra.mrb[4].mxu0 %vm104_vm1, %v95_v37 }
   0xf   :  { %4448 = vmatpush3.bf16.msra.mxu0 %v4985_v38  ;;  %4010 = vmatprep.mubr.msk.f32.mxu0 %vm104_vm1, %v96_v40 }
  0x10   :  { %4455 = vmatprep.subr.bf16.mxu0 %v4813_v0 }
  0x11   :  { %4442 = vmatpush3.bf16.msra.mxu1 %v4929_v10 }
  0x12   :  { %4449 = vmatprep.subr.bf16.mxu1 %v4813_v0  ;;  %4011 = vmatmul.mubr.msk.f32.gmra.mrb[6].mxu0 %vm104_vm1, %v97_v41 }
  0x13   :  { %4043 = vmatprep.mubr.msk.f32.mxu0 %vm4814_vm2, %v4815_v8 }
  0x16   :  { %4044 = vmatmul.mubr.f32.vlgmr.msra.gmra.mrb[8].mxu0 %v4815_v8 }
  0x17   :  { %4457 = vmatpush3.bf16.msra.mxu0 %v4908_v4  ;;  %4065 = vmatprep.mubr.msk.f32.mxu0 %vm4814_vm2, %v4815_v8 }
  0x18   :  { %4458 = vmatprep.subr.bf16.mxu0 %v4813_v0 }
  0x1b   :  { %4460 = vmatpush3.bf16.msra.mxu0 %v4929_v10 }
  0x1c   :  { %4467 = vmatprep.subr.bf16.mxu0 %v4813_v0 }
  0xd8   :  { %v4942_v11 = vpop.f32.mrb[0].mxu0 }
  0xd9   :  { %v199_v13 = vpop.f32.mrb[1].mxu0  ;;  %v205_v59 = vadd.f32 %v4942_v11, %v4947_v12 }
  0xda   :  { %v200_v14 = vadd.f32 %v4947_v12, %v199_v13 }
  0xdc   :  { %v5010_v44 = vpop.f32.mrb[2].mxu0 }
  0xdd   :  { %v5012_v45 = vpop.f32.mrb[3].mxu0 }
  0xde   :  { %v210_v41 = vadd.f32 %v4947_v12, %v5012_v45 }
  0xdf   :  { %v308_v15 = vpop.f32.mrb[0].mxu1 }
  0xe0   :  { %v312_v16 = vadd.f32 %v308_v15, %v200_v14  ;;  %v4023_v17 = vpop.f32.mrb[1].mxu1 }
  0xe1   :  { %v5014_v46 = vpop.f32.mrb[4].mxu0 }
  0xe2   :  { %v3713_v18 = vmul.f32 -1.442695, %v312_v16  ;;  %v5016_v47 = vpop.f32.mrb[5].mxu0 }
  0xe4   :  { %4664 = vpow2.f32 %v3713_v18 }
  0xe5   :  { %v5048_v55 = vpop.f32.mrb[6].mxu0 }
  0xe6   :  { %v5050_v56 = vpop.f32.mrb[7].mxu0 }
  0xe9   :  { %v505_v57 = vpop.f32.mrb[8].mxu0 }
  0xea   :  { %v4045_v58 = vpop.f32.mrb[9].mxu0 }
  0xee   :  { %v4665_v19 = vpop.eup %4664 }
  0xef   :  { %v316_v20 = vadd.f32 1.0, %v4665_v19 }
  0xf1   :  { %4666 = vrcp.f32 %v316_v20 }
  0xfb   :  { %v4667_v21 = vpop.eup %4666 }
  0xfc   :  { %v319_v22 = vmul.f32 2.0, %v4667_v21  ;;  %v321_v26 = vmul.f32 0.0, %v4667_v21 }
  0xfe   :  { %v3714_v23 = vadd.f32 -1.0, %v319_v22 }
 0x100   :  { %323 = vrot.lane.b32.xlu0 %v3714_v23, %s4816_s17 }
 0x172   :  { %v324_v24 = vpop.permute.xlu0 %323 }
 0x173   :  { %v326_v25 = vmul.f32 %v4667_v21, %v324_v24 }
 0x175   :  { %328 = vrot.lane.b32.xlu0 %v326_v25, %s4817_s18 }
 0x1e7   :  { %v329_v27 = vpop.permute.xlu0 %328 }
 0x1e8   :  { %v4952_v28 = vadd.f32 %v329_v27, %v321_v26 }
 0x1ea   :  { %4668 = vtanh.f32 %v4952_v28 }
 0x1f4   :  { %v4669_v39 = vpop.eup %4668 }
 0x1f5   :  { %334 = vrot.lane.b32.xlu1 %v4669_v39, %s4816_s17 }
 0x267   :  { %v335_v42 = vpop.permute.xlu1 %334 }
 0x268   :  { %v337_v43 = vmul.f32 %v4667_v21, %v335_v42 }
 0x26a   :  { %339 = vrot.lane.b32.xlu1 %v337_v43, %s4817_s18 }
 0x2dc   :  { %v340_v53 = vpop.permute.xlu1 %339 }
 0x2dd   :  { %4033 = vmatmul.mubr.msk.f32.vlgmr.msra.gmra.mrb[2].mxu1 %vm238_vm3, %v340_v53 }
 0x2de   :  { %4451 = vmatpush3.bf16.msra.mxu1 %v5024_v50  ;;  %4054 = vmatprep.mubr.msk.f32.mxu1 %vm4814_vm2, %v4815_v8 }
 0x2df   :  { %4452 = vmatprep.subr.bf16.mxu1 %v4813_v0 }
 0x2e2   :  { %4454 = vmatpush3.bf16.msra.mxu1 %v5034_v54 }
 0x2e3   :  { %4461 = vmatprep.subr.bf16.mxu1 %v4813_v0 }
 0x2e5   :  { %4055 = vmatmul.mubr.msk.f32.vlgmr.msra.gmra.mrb[4].mxu1 %vm238_vm3, %v340_v53 }
 0x2e6   :  { %4463 = vmatpush3.bf16.msra.mxu1 %v4971_v34  ;;  %4076 = vmatprep.mubr.msk.f32.mxu1 %vm4814_vm2, %v4815_v8 }
 0x2e7   :  { %4464 = vmatprep.subr.bf16.mxu1 %v4813_v0 }
 0x2ea   :  { %4466 = vmatpush3.bf16.msra.mxu1 %v4985_v38 }
 0x2eb   :  { %4473 = vmatprep.subr.bf16.mxu1 %v4813_v0 }
 0x3b0   :  { %v409_v60 = vpop.f32.mrb[2].mxu1 }
 0x3b1   :  { %v413_v61 = vadd.f32 %v409_v60, %v205_v59  ;;  %v4034_v62 = vpop.f32.mrb[3].mxu1 }
 0x3b3   :  { %v3716_v63 = vmul.f32 -1.442695, %v413_v61 }
 0x3b5   :  { %4670 = vpow2.f32 %v3716_v63 }
 0x3b8   :  { %v575_v2 = vpop.f32.mrb[4].mxu1 }
 0x3b9   :  { %v576_v3 = vadd.f32 %v575_v2, %v505_v57  ;;  %v4056_v5 = vpop.f32.mrb[5].mxu1 }
 0x3bb   :  { %v585_v6 = vadd.f32 %v5057_v1, %v576_v3 }
 0x3bd   :  { %v3720_v7 = vmul.f32 -1.442695, %v585_v6 }
 0x3bf   :  { %v4671_v9 = vpop.eup %4670  ;;  %4672 = vpow2.f32 %v3720_v7 }
 0x3c0   :  { %v417_v13 = vadd.f32 1.0, %v4671_v9 }
 0x3c2   :  { %4674 = vrcp.f32 %v417_v13 }
 0x3c9   :  { %v4673_v11 = vpop.eup %4672 }
 0x3ca   :  { %v589_v14 = vadd.f32 1.0, %v4673_v11 }
 0x3cc   :  { %v4675_v15 = vpop.eup %4674  ;;  %4676 = vrcp.f32 %v589_v14 }
 0x3cd   :  { %v420_v16 = vmul.f32 2.0, %v4675_v15  ;;  %v422_v25 = vmul.f32 %v4675_v15, %v4952_v28 }
 0x3cf   :  { %v3717_v17 = vadd.f32 -1.0, %v420_v16 }
 0x3d1   :  { %424 = vrot.lane.b32.xlu0 %v3717_v17, %s4816_s17 }
 0x3d6   :  { %v4677_v18 = vpop.eup %4676 }
 0x3d7   :  { %v592_v19 = vmul.f32 2.0, %v4677_v18  ;;  %v594_v29 = vmul.f32 0.0, %v4677_v18 }
 0x3d9   :  { %v3721_v20 = vadd.f32 -1.0, %v592_v19 }
 0x3db   :  { %596 = vrot.lane.b32.xlu1 %v3721_v20, %s4816_s17 }
 0x443   :  { %v425_v21 = vpop.permute.xlu0 %424 }
 0x444   :  { %v427_v22 = vmul.f32 %v4675_v15, %v425_v21 }
 0x446   :  { %429 = vrot.lane.b32.xlu0 %v427_v22, %s4817_s18 }
 0x44d   :  { %v597_v23 = vpop.permute.xlu1 %596 }
 0x44e   :  { %v599_v24 = vmul.f32 %v4677_v18, %v597_v23 }
 0x450   :  { %601 = vrot.lane.b32.xlu1 %v599_v24, %s4817_s18 }
 0x4b8   :  { %v430_v26 = vpop.permute.xlu0 %429 }
 0x4b9   :  { %v5065_v27 = vadd.f32 %v430_v26, %v422_v25 }
 0x4bb   :  { %4678 = vtanh.f32 %v5065_v27 }
 0x4c2   :  { %v602_v30 = vpop.permute.xlu1 %601 }
 0x4c3   :  { %v5068_v31 = vadd.f32 %v602_v30, %v594_v29 }
 0x4c5   :  { %v4679_v32 = vpop.eup %4678  ;;  %4680 = vtanh.f32 %v5068_v31 }
 0x4c6   :  { %435 = vrot.lane.b32.xlu0 %v4679_v32, %s4816_s17 }
 0x4cf   :  { %v4681_v33 = vpop.eup %4680 }
 0x4d0   :  { %607 = vrot.lane.b32.xlu1 %v4681_v33, %s4816_s17 }
 0x538   :  { %v436_v35 = vpop.permute.xlu0 %435 }
 0x539   :  { %v438_v36 = vmul.f32 %v4675_v15, %v436_v35 }
 0x53b   :  { %612 = vrot.lane.b32.xlu0 %v438_v36, %s4817_s18 }
 0x542   :  { %v608_v28 = vpop.permute.xlu1 %607 }
 0x543   :  { %v610_v37 = vmul.f32 %v4677_v18, %v608_v28 }
 0x545   :  { %713 = vrot.lane.b32.xlu1 %v610_v37, %s4817_s18 }
 0x5ad   :  { %v613_v39 = vpop.permute.xlu0 %612 }
 0x5ae   :  { %4066 = vmatmul.mubr.msk.f32.vlgmr.msra.gmra.mrb[10].mxu0 %vm238_vm3, %v613_v39 }
 0x5af   :  { %4469 = vmatpush3.bf16.msra.mxu0 %v5024_v50  ;;  %4087 = vmatprep.mubr.msk.f32.mxu0 %vm4814_vm2, %v4815_v8 }
 0x5b0   :  { %4470 = vmatprep.subr.bf16.mxu0 %v4813_v0 }
 0x5b3   :  { %4472 = vmatpush3.bf16.msra.mxu0 %v5034_v54 }
 0x5b4   :  { %4479 = vmatprep.subr.bf16.mxu0 %v4813_v0 }
 0x5b6   :  { %4088 = vmatmul.mubr.msk.f32.vlgmr.msra.gmra.mrb[12].mxu0 %vm238_vm3, %v613_v39 }
 0x5b7   :  { %v714_v40 = vpop.permute.xlu1 %713  ;;  %4481 = vmatpush3.bf16.msra.mxu0 %v4971_v34  ;;  %4109 = vmatprep.mubr.msk.f32.mxu0 %vm4814_vm2, %v4815_v8 }
 0x5b8   :  { %4077 = vmatmul.mubr.msk.f32.vlgmr.msra.gmra.mrb[6].mxu1 %vm238_vm3, %v714_v40  ;;  %4482 = vmatprep.subr.bf16.mxu0 %v4813_v0 }
 0x5b9   :  { %4475 = vmatpush3.bf16.msra.mxu1 %v4908_v4  ;;  %4098 = vmatprep.mubr.msk.f32.mxu1 %vm4814_vm2, %v4815_v8 }
 0x5ba   :  { %4476 = vmatprep.subr.bf16.mxu1 %v4813_v0 }
 0x5bb   :  { %4484 = vmatpush3.bf16.msra.mxu0 %v4985_v38 }
 0x5bc   :  { %4491 = vmatprep.subr.bf16.mxu0 %v4813_v0 }
 0x5bd   :  { %4478 = vmatpush3.bf16.msra.mxu1 %v4929_v10 }
 0x5be   :  { %4485 = vmatprep.subr.bf16.mxu1 %v4813_v0 }
 0x681   :  { %v682_v42 = vpop.f32.mrb[10].mxu0 }
 0x682   :  { %v686_v43 = vadd.f32 %v682_v42, %v210_v41  ;;  %v4067_v48 = vpop.f32.mrb[11].mxu0 }
 0x684   :  { %v3723_v49 = vmul.f32 -1.442695, %v686_v43 }
 0x686   :  { %4682 = vpow2.f32 %v3723_v49 }
 0x689   :  { %v853_v51 = vpop.f32.mrb[12].mxu0 }
 0x68a   :  { %v4089_v52 = vpop.f32.mrb[13].mxu0 }
 0x68b   :  { %v783_v53 = vpop.f32.mrb[6].mxu1 }
 0x68c   :  { %v854_v57 = vadd.f32 %v853_v51, %v783_v53  ;;  %v4078_v58 = vpop.f32.mrb[7].mxu1 }
 0x68e   :  { %v857_v59 = vadd.f32 %v5057_v1, %v854_v57 }
 0x690   :  { %v4683_v60 = vpop.eup %4682  ;;  %v3727_v61 = vmul.f32 -1.442695, %v857_v59 }
 0x691   :  { %v690_v62 = vadd.f32 1.0, %v4683_v60 }
 0x692   :  { %4684 = vpow2.f32 %v3727_v61 }
 0x693   :  { %4686 = vrcp.f32 %v690_v62 }
 0x69c   :  { %v4685_v63 = vpop.eup %4684 }
 0x69d   :  { %v4687_v2 = vpop.eup %4686  ;;  %v861_v45 = vadd.f32 1.0, %v4685_v63 }
 0x69e   :  { %v693_v3 = vmul.f32 2.0, %v4687_v2  ;;  %v695_v16 = vmul.f32 %v4687_v2, %v5065_v27 }
 0x69f   :  { %4688 = vrcp.f32 %v861_v45 }
 0x6a0   :  { %v3724_v5 = vadd.f32 -1.0, %v693_v3 }
 0x6a2   :  { %697 = vrot.lane.b32.xlu0 %v3724_v5, %s4816_s17 }
 0x6a9   :  { %v4689_v6 = vpop.eup %4688 }
 0x6aa   :  { %v864_v7 = vmul.f32 2.0, %v4689_v6  ;;  %v866_v19 = vmul.f32 %v4689_v6, %v5068_v31  ;;  %v215_v31 = vadd.f32 %v5010_v44, %v4947_v12 }
 0x6ac   :  { %v3728_v9 = vadd.f32 -1.0, %v864_v7 }
 0x6ae   :  { %868 = vrot.lane.b32.xlu1 %v3728_v9, %s4816_s17 }
 0x714   :  { %v698_v13 = vpop.permute.xlu0 %697 }
 0x715   :  { %v700_v11 = vmul.f32 %v4687_v2, %v698_v13 }
 0x717   :  { %702 = vrot.lane.b32.xlu0 %v700_v11, %s4817_s18 }
 0x720   :  { %v869_v14 = vpop.permute.xlu1 %868 }
 0x721   :  { %v871_v15 = vmul.f32 %v4689_v6, %v869_v14 }
 0x723   :  { %873 = vrot.lane.b32.xlu1 %v871_v15, %s4817_s18 }
 0x789   :  { %v703_v17 = vpop.permute.xlu0 %702 }
 0x78a   :  { %v5104_v18 = vadd.f32 %v703_v17, %v695_v16 }
 0x78c   :  { %4690 = vtanh.f32 %v5104_v18 }
 0x795   :  { %v874_v20 = vpop.permute.xlu1 %873 }
 0x796   :  { %v4691_v21 = vpop.eup %4690  ;;  %v5108_v22 = vadd.f32 %v874_v20, %v866_v19  ;;  %v220_v20 = vadd.f32 %v4947_v12, %v5016_v47 }
 0x797   :  { %708 = vrot.lane.b32.xlu0 %v4691_v21, %s4816_s17 }
 0x798   :  { %4692 = vtanh.f32 %v5108_v22 }
 0x7a2   :  { %v4693_v23 = vpop.eup %4692 }
 0x7a3   :  { %879 = vrot.lane.b32.xlu1 %v4693_v23, %s4816_s17 }
 0x809   :  { %v709_v24 = vpop.permute.xlu0 %708 }
 0x80a   :  { %v711_v25 = vmul.f32 %v4687_v2, %v709_v24 }
 0x80c   :  { %884 = vrot.lane.b32.xlu0 %v711_v25, %s4817_s18 }
 0x815   :  { %v880_v26 = vpop.permute.xlu1 %879 }
 0x816   :  { %v882_v27 = vmul.f32 %v4689_v6, %v880_v26 }
 0x818   :  { %985 = vrot.lane.b32.xlu1 %v882_v27, %s4817_s18 }
 0x87e   :  { %v885_v29 = vpop.permute.xlu0 %884 }
 0x87f   :  { %4099 = vmatmul.mubr.msk.f32.vlgmr.msra.gmra.mrb[8].mxu1 %vm238_vm3, %v885_v29 }
 0x880   :  { %4487 = vmatpush3.bf16.msra.mxu1 %v5024_v50  ;;  %4120 = vmatprep.mubr.msk.f32.mxu1 %vm4814_vm2, %v4815_v8 }
 0x881   :  { %4488 = vmatprep.subr.bf16.mxu1 %v4813_v0 }
 0x884   :  { %4490 = vmatpush3.bf16.msra.mxu1 %v5034_v54 }
 0x885   :  { %4497 = vmatprep.subr.bf16.mxu1 %v4813_v0 }
 0x887   :  { %4121 = vmatmul.mubr.msk.f32.vlgmr.msra.gmra.mrb[10].mxu1 %vm238_vm3, %v885_v29 }
 0x888   :  { %4499 = vmatpush3.bf16.msra.mxu1 %v4971_v34  ;;  %4142 = vmatprep.mubr.msk.f32.mxu1 %vm4814_vm2, %v4815_v8 }
 0x889   :  { %4500 = vmatprep.subr.bf16.mxu1 %v4813_v0 }
 0x88a   :  { %v986_v30 = vpop.permute.xlu1 %985 }
 0x88b   :  { %4110 = vmatmul.mubr.msk.f32.vlgmr.msra.gmra.mrb[14].mxu0 %vm238_vm3, %v986_v30 }
 0x88c   :  { %4493 = vmatpush3.bf16.msra.mxu0 %v4908_v4  ;;  %4131 = vmatprep.mubr.msk.f32.mxu0 %vm4814_vm2, %v4815_v8 }
 0x88d   :  { %4494 = vmatprep.subr.bf16.mxu0 %v4813_v0  ;;  %4502 = vmatpush3.bf16.msra.mxu1 %v4985_v38 }
 0x88e   :  { %4509 = vmatprep.subr.bf16.mxu1 %v4813_v0 }
 0x890   :  { %4496 = vmatpush3.bf16.msra.mxu0 %v4929_v10 }
 0x891   :  { %4503 = vmatprep.subr.bf16.mxu0 %v4813_v0 }
 0x952   :  { %v954_v32 = vpop.f32.mrb[8].mxu1 }
 0x953   :  { %v958_v33 = vadd.f32 %v954_v32, %v215_v31  ;;  %v4100_v35 = vpop.f32.mrb[9].mxu1 }
 0x955   :  { %v3730_v36 = vmul.f32 -1.442695, %v958_v33 }
 0x957   :  { %4694 = vpow2.f32 %v3730_v36 }
 0x95a   :  { %v1125_v28 = vpop.f32.mrb[10].mxu1 }
 0x95b   :  { %v4122_v37 = vpop.f32.mrb[11].mxu1 }
 0x95e   :  { %v1055_v39 = vpop.f32.mrb[14].mxu0 }
 0x95f   :  { %v1126_v40 = vadd.f32 %v1125_v28, %v1055_v39  ;;  %v4111_v41 = vpop.f32.mrb[15].mxu0 }
 0x961   :  { %v4695_v42 = vpop.eup %4694  ;;  %v1129_v43 = vadd.f32 %v5057_v1, %v1126_v40 }
 0x962   :  { %v962_v48 = vadd.f32 1.0, %v4695_v42 }
 0x963   :  { %v3734_v49 = vmul.f32 -1.442695, %v1129_v43 }
 0x964   :  { %4696 = vrcp.f32 %v962_v48 }
 0x965   :  { %4698 = vpow2.f32 %v3734_v49 }
 0x96e   :  { %v4697_v51 = vpop.eup %4696 }
 0x96f   :  { %v4699_v52 = vpop.eup %4698  ;;  %v965_v44 = vmul.f32 2.0, %v4697_v51  ;;  %v967_v45 = vmul.f32 %v4697_v51, %v5104_v18 }
 0x970   :  { %v1133_v53 = vadd.f32 1.0, %v4699_v52 }
 0x971   :  { %v3731_v57 = vadd.f32 -1.0, %v965_v44 }
 0x972   :  { %4700 = vrcp.f32 %v1133_v53 }
 0x973   :  { %969 = vrot.lane.b32.xlu0 %v3731_v57, %s4816_s17 }
 0x97c   :  { %v4701_v58 = vpop.eup %4700 }
 0x97d   :  { %v1136_v59 = vmul.f32 2.0, %v4701_v58  ;;  %v1138_v7 = vmul.f32 %v4701_v58, %v5108_v22 }
 0x97f   :  { %v3735_v60 = vadd.f32 -1.0, %v1136_v59 }
 0x981   :  { %1140 = vrot.lane.b32.xlu1 %v3735_v60, %s4816_s17 }
 0x9e5   :  { %v970_v61 = vpop.permute.xlu0 %969 }
 0x9e6   :  { %v972_v62 = vmul.f32 %v4697_v51, %v970_v61 }
 0x9e8   :  { %974 = vrot.lane.b32.xlu0 %v972_v62, %s4817_s18 }
 0x9f3   :  { %v1141_v63 = vpop.permute.xlu1 %1140 }
 0x9f4   :  { %v1143_v2 = vmul.f32 %v4701_v58, %v1141_v63 }
 0x9f6   :  { %1145 = vrot.lane.b32.xlu1 %v1143_v2, %s4817_s18 }
 0xa5a   :  { %v975_v3 = vpop.permute.xlu0 %974 }
 0xa5b   :  { %v5144_v5 = vadd.f32 %v975_v3, %v967_v45 }
 0xa5d   :  { %4702 = vtanh.f32 %v5144_v5 }
 0xa67   :  { %v4703_v6 = vpop.eup %4702 }
 0xa68   :  { %v1146_v9 = vpop.permute.xlu1 %1145  ;;  %980 = vrot.lane.b32.xlu0 %v4703_v6, %s4816_s17  ;;  %v225_v6 = vadd.f32 %v5014_v46, %v4947_v12 }
 0xa69   :  { %v5149_v13 = vadd.f32 %v1146_v9, %v1138_v7 }
 0xa6b   :  { %4704 = vtanh.f32 %v5149_v13 }
 0xa75   :  { %v4705_v11 = vpop.eup %4704 }
 0xa76   :  { %1151 = vrot.lane.b32.xlu1 %v4705_v11, %s4816_s17 }
 0xada   :  { %v981_v14 = vpop.permute.xlu0 %980 }
 0xadb   :  { %v983_v15 = vmul.f32 %v4697_v51, %v981_v14 }
 0xadd   :  { %1156 = vrot.lane.b32.xlu0 %v983_v15, %s4817_s18 }
 0xae8   :  { %v1152_v16 = vpop.permute.xlu1 %1151 }
 0xae9   :  { %v1154_v17 = vmul.f32 %v4701_v58, %v1152_v16 }
 0xaeb   :  { %1257 = vrot.lane.b32.xlu1 %v1154_v17, %s4817_s18 }
 0xb4f   :  { %v1157_v18 = vpop.permute.xlu0 %1156 }
 0xb50   :  { %4132 = vmatmul.mubr.msk.f32.vlgmr.msra.gmra.mrb[16].mxu0 %vm238_vm3, %v1157_v18 }
 0xb51   :  { %4505 = vmatpush3.bf16.msra.mxu0 %v5024_v50  ;;  %4153 = vmatprep.mubr.msk.f32.mxu0 %vm4814_vm2, %v4815_v8 }
 0xb52   :  { %4506 = vmatprep.subr.bf16.mxu0 %v4813_v0 }
 0xb55   :  { %4508 = vmatpush3.bf16.msra.mxu0 %v5034_v54 }
 0xb56   :  { %4515 = vmatprep.subr.bf16.mxu0 %v4813_v0 }
 0xb58   :  { %4154 = vmatmul.mubr.msk.f32.vlgmr.msra.gmra.mrb[18].mxu0 %vm238_vm3, %v1157_v18 }
 0xb59   :  { %4517 = vmatpush3.bf16.msra.mxu0 %v4971_v34  ;;  %4175 = vmatprep.mubr.msk.f32.mxu0 %vm4814_vm2, %v4815_v8 }
 0xb5a   :  { %4518 = vmatprep.subr.bf16.mxu0 %v4813_v0 }
 0xb5d   :  { %v1258_v19 = vpop.permute.xlu1 %1257  ;;  %4520 = vmatpush3.bf16.msra.mxu0 %v4985_v38 }
 0xb5e   :  { %4143 = vmatmul.mubr.msk.f32.vlgmr.msra.gmra.mrb[12].mxu1 %vm238_vm3, %v1258_v19  ;;  %4527 = vmatprep.subr.bf16.mxu0 %v4813_v0 }
 0xb5f   :  { %4511 = vmatpush3.bf16.msra.mxu1 %v4908_v4  ;;  %4164 = vmatprep.mubr.msk.f32.mxu1 %vm4814_vm2, %v4815_v8 }
 0xb60   :  { %4512 = vmatprep.subr.bf16.mxu1 %v4813_v0 }
 0xb63   :  { %4514 = vmatpush3.bf16.msra.mxu1 %v4929_v10 }
 0xb64   :  { %4521 = vmatprep.subr.bf16.mxu1 %v4813_v0 }
 0xc23   :  { %v1226_v21 = vpop.f32.mrb[16].mxu0 }
 0xc24   :  { %v1230_v22 = vadd.f32 %v1226_v21, %v220_v20  ;;  %v4133_v23 = vpop.f32.mrb[17].mxu0 }
 0xc26   :  { %v3737_v24 = vmul.f32 -1.442695, %v1230_v22 }
 0xc28   :  { %4706 = vpow2.f32 %v3737_v24 }
 0xc2b   :  { %v1397_v25 = vpop.f32.mrb[18].mxu0 }
 0xc2c   :  { %v4155_v26 = vpop.f32.mrb[19].mxu0 }
 0xc31   :  { %v1327_v27 = vpop.f32.mrb[12].mxu1 }
 0xc32   :  { %v4707_v29 = vpop.eup %4706  ;;  %v1398_v30 = vadd.f32 %v1397_v25, %v1327_v27  ;;  %v4144_v31 = vpop.f32.mrb[13].mxu1 }
 0xc33   :  { %v1234_v32 = vadd.f32 1.0, %v4707_v29 }
 0xc34   :  { %v1401_v33 = vadd.f32 %v5057_v1, %v1398_v30 }
 0xc35   :  { %4708 = vrcp.f32 %v1234_v32 }
 0xc36   :  { %v3741_v35 = vmul.f32 -1.442695, %v1401_v33 }
 0xc38   :  { %4710 = vpow2.f32 %v3741_v35 }
 0xc3f   :  { %v4709_v36 = vpop.eup %4708 }
 0xc40   :  { %v1237_v28 = vmul.f32 2.0, %v4709_v36  ;;  %v1239_v52 = vmul.f32 %v4709_v36, %v5144_v5 }
 0xc42   :  { %v4711_v47 = vpop.eup %4710  ;;  %v3738_v37 = vadd.f32 -1.0, %v1237_v28 }
 0xc43   :  { %v1405_v39 = vadd.f32 1.0, %v4711_v47 }
 0xc44   :  { %1241 = vrot.lane.b32.xlu0 %v3738_v37, %s4816_s17 }
 0xc45   :  { %4712 = vrcp.f32 %v1405_v39 }
 0xc4f   :  { %v4713_v40 = vpop.eup %4712 }
 0xc50   :  { %v1408_v41 = vmul.f32 2.0, %v4713_v40  ;;  %v1410_v58 = vmul.f32 %v4713_v40, %v5149_v13 }
 0xc52   :  { %v3742_v42 = vadd.f32 -1.0, %v1408_v41 }
 0xc54   :  { %1412 = vrot.lane.b32.xlu1 %v3742_v42, %s4816_s17 }
 0xcb6   :  { %v1242_v43 = vpop.permute.xlu0 %1241 }
 0xcb7   :  { %v1244_v48 = vmul.f32 %v4709_v36, %v1242_v43 }
 0xcb9   :  { %1246 = vrot.lane.b32.xlu0 %v1244_v48, %s4817_s18 }
 0xcc6   :  { %v1413_v49 = vpop.permute.xlu1 %1412 }
 0xcc7   :  { %v1415_v51 = vmul.f32 %v4713_v40, %v1413_v49 }
 0xcc9   :  { %1417 = vrot.lane.b32.xlu1 %v1415_v51, %s4817_s18 }
 0xd2b   :  { %v1247_v44 = vpop.permute.xlu0 %1246 }
 0xd2c   :  { %v5184_v53 = vadd.f32 %v1247_v44, %v1239_v52 }
 0xd2e   :  { %4714 = vtanh.f32 %v5184_v53 }
 0xd38   :  { %v4715_v57 = vpop.eup %4714 }
 0xd39   :  { %1252 = vrot.lane.b32.xlu0 %v4715_v57, %s4816_s17 }
 0xd3b   :  { %v1418_v59 = vpop.permute.xlu1 %1417 }
 0xd3c   :  { %v5189_v60 = vadd.f32 %v1418_v59, %v1410_v58 }
 0xd3e   :  { %4716 = vtanh.f32 %v5189_v60 }
 0xd48   :  { %v4717_v61 = vpop.eup %4716 }
 0xd49   :  { %1423 = vrot.lane.b32.xlu1 %v4717_v61, %s4816_s17 }
 0xdab   :  { %v1253_v62 = vpop.permute.xlu0 %1252 }
 0xdac   :  { %v1255_v63 = vmul.f32 %v4709_v36, %v1253_v62 }
 0xdae   :  { %1428 = vrot.lane.b32.xlu0 %v1255_v63, %s4817_s18 }
 0xdbb   :  { %v1424_v2 = vpop.permute.xlu1 %1423 }
 0xdbc   :  { %v1426_v45 = vmul.f32 %v4713_v40, %v1424_v2 }
 0xdbe   :  { %1529 = vrot.lane.b32.xlu1 %v1426_v45, %s4817_s18 }
 0xe20   :  { %v1429_v3 = vpop.permute.xlu0 %1428 }
 0xe21   :  { %4165 = vmatmul.mubr.msk.f32.vlgmr.msra.gmra.mrb[14].mxu1 %vm238_vm3, %v1429_v3 }
 0xe22   :  { %4523 = vmatpush3.bf16.msra.mxu1 %v5024_v50  ;;  %4186 = vmatprep.mubr.msk.f32.mxu1 %vm4814_vm2, %v4815_v8 }
 0xe23   :  { %4524 = vmatprep.subr.bf16.mxu1 %v4813_v0 }
 0xe26   :  { %4526 = vmatpush3.bf16.msra.mxu1 %v5034_v54 }
 0xe27   :  { %4533 = vmatprep.subr.bf16.mxu1 %v4813_v0 }
 0xe29   :  { %4187 = vmatmul.mubr.msk.f32.vlgmr.msra.gmra.mrb[16].mxu1 %vm238_vm3, %v1429_v3 }
 0xe2a   :  { %4535 = vmatpush3.bf16.msra.mxu1 %v4971_v34  ;;  %4208 = vmatprep.mubr.msk.f32.mxu1 %vm4814_vm2, %v4815_v8 }
 0xe2b   :  { %4536 = vmatprep.subr.bf16.mxu1 %v4813_v0 }
 0xe2e   :  { %4538 = vmatpush3.bf16.msra.mxu1 %v4985_v38 }
 0xe2f   :  { %4545 = vmatprep.subr.bf16.mxu1 %v4813_v0 }
 0xe30   :  { %v1530_v5 = vpop.permute.xlu1 %1529 }
 0xe31   :  { %4176 = vmatmul.mubr.msk.f32.vlgmr.msra.gmra.mrb[20].mxu0 %vm238_vm3, %v1530_v5 }
 0xe32   :  { %4529 = vmatpush3.bf16.msra.mxu0 %v4908_v4  ;;  %4197 = vmatprep.mubr.msk.f32.mxu0 %vm4814_vm2, %v4815_v8 }
 0xe33   :  { %4530 = vmatprep.subr.bf16.mxu0 %v4813_v0 }
 0xe36   :  { %4532 = vmatpush3.bf16.msra.mxu0 %v4929_v10 }
 0xe37   :  { %4539 = vmatprep.subr.bf16.mxu0 %v4813_v0 }
 0xef4   :  { %v1498_v7 = vpop.f32.mrb[14].mxu1 }
 0xef5   :  { %v1502_v9 = vadd.f32 %v1498_v7, %v225_v6  ;;  %v4166_v13 = vpop.f32.mrb[15].mxu1 }
 0xef7   :  { %v3744_v11 = vmul.f32 -1.442695, %v1502_v9 }
 0xef9   :  { %4718 = vpow2.f32 %v3744_v11 }
 0xefc   :  { %v1669_v14 = vpop.f32.mrb[16].mxu1 }
 0xefd   :  { %v4188_v15 = vpop.f32.mrb[17].mxu1 }
 0xf03   :  { %v4719_v16 = vpop.eup %4718 }
 0xf04   :  { %v1506_v17 = vadd.f32 1.0, %v4719_v16  ;;  %v1599_v18 = vpop.f32.mrb[20].mxu0 }
 0xf05   :  { %v1670_v19 = vadd.f32 %v1669_v14, %v1599_v18  ;;  %v4177_v20 = vpop.f32.mrb[21].mxu0 }
 0xf06   :  { %4720 = vrcp.f32 %v1506_v17 }
 0xf07   :  { %v1673_v21 = vadd.f32 %v5057_v1, %v1670_v19 }
 0xf09   :  { %v3748_v22 = vmul.f32 -1.442695, %v1673_v21 }
 0xf0b   :  { %4722 = vpow2.f32 %v3748_v22 }
 0xf10   :  { %v4721_v23 = vpop.eup %4720 }
 0xf11   :  { %v1509_v24 = vmul.f32 2.0, %v4721_v23  ;;  %v1511_v36 = vmul.f32 %v4721_v23, %v5184_v53  ;;  %v230_v53 = vadd.f32 %v4947_v12, %v5050_v56 }
 0xf13   :  { %v3745_v46 = vadd.f32 -1.0, %v1509_v24 }
 0xf15   :  { %v4723_v25 = vpop.eup %4722  ;;  %1513 = vrot.lane.b32.xlu0 %v3745_v46, %s4816_s17 }
 0xf16   :  { %v1677_v26 = vadd.f32 1.0, %v4723_v25 }
 0xf18   :  { %4724 = vrcp.f32 %v1677_v26 }
 0xf22   :  { %v4725_v27 = vpop.eup %4724 }
 0xf23   :  { %v1680_v29 = vmul.f32 2.0, %v4725_v27  ;;  %v1682_v39 = vmul.f32 %v4725_v27, %v5189_v60 }
 0xf25   :  { %v3749_v30 = vadd.f32 -1.0, %v1680_v29 }
 0xf27   :  { %1684 = vrot.lane.b32.xlu1 %v3749_v30, %s4816_s17 }
 0xf87   :  { %v1514_v31 = vpop.permute.xlu0 %1513 }
 0xf88   :  { %v1516_v32 = vmul.f32 %v4721_v23, %v1514_v31 }
 0xf8a   :  { %1518 = vrot.lane.b32.xlu0 %v1516_v32, %s4817_s18 }
 0xf99   :  { %v1685_v33 = vpop.permute.xlu1 %1684 }
 0xf9a   :  { %v1687_v35 = vmul.f32 %v4725_v27, %v1685_v33 }
 0xf9c   :  { %1689 = vrot.lane.b32.xlu1 %v1687_v35, %s4817_s18 }
 0xffc   :  { %v1519_v28 = vpop.permute.xlu0 %1518 }
 0xffd   :  { %v5224_v47 = vadd.f32 %v1519_v28, %v1511_v36 }
 0xfff   :  { %4726 = vtanh.f32 %v5224_v47 }
0x1009   :  { %v4727_v37 = vpop.eup %4726 }
0x100a   :  { %1524 = vrot.lane.b32.xlu0 %v4727_v37, %s4816_s17 }
0x100e   :  { %v1690_v40 = vpop.permute.xlu1 %1689 }
0x100f   :  { %v5229_v41 = vadd.f32 %v1690_v40, %v1682_v39 }
0x1011   :  { %4728 = vtanh.f32 %v5229_v41 }
0x101b   :  { %v4729_v42 = vpop.eup %4728 }
0x101c   :  { %1695 = vrot.lane.b32.xlu1 %v4729_v42, %s4816_s17 }
0x107c   :  { %v1525_v43 = vpop.permute.xlu0 %1524 }
0x107d   :  { %v1527_v48 = vmul.f32 %v4721_v23, %v1525_v43 }
0x107f   :  { %1700 = vrot.lane.b32.xlu0 %v1527_v48, %s4817_s18 }
0x108e   :  { %v1696_v49 = vpop.permute.xlu1 %1695 }
0x108f   :  { %v1698_v51 = vmul.f32 %v4725_v27, %v1696_v49 }
0x1091   :  { %1801 = vrot.lane.b32.xlu1 %v1698_v51, %s4817_s18 }
0x10f1   :  { %v1701_v52 = vpop.permute.xlu0 %1700 }
0x10f2   :  { %4198 = vmatmul.mubr.msk.f32.vlgmr.msra.gmra.mrb[22].mxu0 %vm238_vm3, %v1701_v52 }
0x10f3   :  { %4541 = vmatpush3.bf16.msra.mxu0 %v5024_v50  ;;  %4219 = vmatprep.mubr.msk.f32.mxu0 %vm4814_vm2, %v4815_v8 }
0x10f4   :  { %4542 = vmatprep.subr.bf16.mxu0 %v4813_v0 }
0x10f7   :  { %4544 = vmatpush3.bf16.msra.mxu0 %v5034_v54 }
0x10f8   :  { %4551 = vmatprep.subr.bf16.mxu0 %v4813_v0 }
0x10fa   :  { %4220 = vmatmul.mubr.msk.f32.vlgmr.msra.gmra.mrb[24].mxu0 %vm238_vm3, %v1701_v52 }
0x10fb   :  { %4553 = vmatpush3.bf16.msra.mxu0 %v4971_v34  ;;  %4241 = vmatprep.mubr.msk.f32.mxu0 %vm4814_vm2, %v4815_v8 }
0x10fc   :  { %4554 = vmatprep.subr.bf16.mxu0 %v4813_v0 }
0x10ff   :  { %4556 = vmatpush3.bf16.msra.mxu0 %v4985_v38 }
0x1100   :  { %4563 = vmatprep.subr.bf16.mxu0 %v4813_v0 }
0x1103   :  { %v1802_v44 = vpop.permute.xlu1 %1801 }
0x1104   :  { %4209 = vmatmul.mubr.msk.f32.vlgmr.msra.gmra.mrb[18].mxu1 %vm238_vm3, %v1802_v44 }
0x1105   :  { %4547 = vmatpush3.bf16.msra.mxu1 %v4908_v4  ;;  %4230 = vmatprep.mubr.msk.f32.mxu1 %vm4814_vm2, %v4815_v8 }
0x1106   :  { %4548 = vmatprep.subr.bf16.mxu1 %v4813_v0 }
0x1109   :  { %4550 = vmatpush3.bf16.msra.mxu1 %v4929_v10 }
0x110a   :  { %4557 = vmatprep.subr.bf16.mxu1 %v4813_v0 }
0x11c5   :  { %v1770_v57 = vpop.f32.mrb[22].mxu0 }
0x11c6   :  { %v1774_v58 = vadd.f32 %v1770_v57, %v230_v53  ;;  %v4199_v59 = vpop.f32.mrb[23].mxu0 }
0x11c8   :  { %v3751_v60 = vmul.f32 -1.442695, %v1774_v58 }
0x11ca   :  { %4730 = vpow2.f32 %v3751_v60 }
0x11cd   :  { %v1941_v61 = vpop.f32.mrb[24].mxu0 }
0x11ce   :  { %v4221_v62 = vpop.f32.mrb[25].mxu0 }
0x11d4   :  { %v4731_v4 = vpop.eup %4730 }
0x11d5   :  { %v1778_v63 = vadd.f32 1.0, %v4731_v4 }
0x11d7   :  { %4732 = vrcp.f32 %v1778_v63  ;;  %v1871_v2 = vpop.f32.mrb[18].mxu1 }
0x11d8   :  { %v1942_v45 = vadd.f32 %v1941_v61, %v1871_v2  ;;  %v4210_v3 = vpop.f32.mrb[19].mxu1 }
0x11da   :  { %v1945_v10 = vadd.f32 %v5057_v1, %v1942_v45 }
0x11dc   :  { %v3755_v5 = vmul.f32 -1.442695, %v1945_v10 }
0x11de   :  { %4734 = vpow2.f32 %v3755_v5 }
0x11e1   :  { %v4733_v6 = vpop.eup %4732 }
0x11e2   :  { %v1781_v7 = vmul.f32 2.0, %v4733_v6  ;;  %v1783_v19 = vmul.f32 %v4733_v6, %v5224_v47 }
0x11e4   :  { %v3752_v12 = vadd.f32 -1.0, %v1781_v7 }
0x11e6   :  { %1785 = vrot.lane.b32.xlu0 %v3752_v12, %s4816_s17 }
0x11e8   :  { %v4735_v56 = vpop.eup %4734 }
0x11e9   :  { %v1949_v9 = vadd.f32 1.0, %v4735_v56 }
0x11eb   :  { %4736 = vrcp.f32 %v1949_v9 }
0x11f5   :  { %v4737_v13 = vpop.eup %4736 }
0x11f6   :  { %v1952_v11 = vmul.f32 2.0, %v4737_v13  ;;  %v1954_v23 = vmul.f32 %v4737_v13, %v5229_v41 }
0x11f8   :  { %v3756_v14 = vadd.f32 -1.0, %v1952_v11 }
0x11fa   :  { %1956 = vrot.lane.b32.xlu1 %v3756_v14, %s4816_s17 }
0x1258   :  { %v1786_v15 = vpop.permute.xlu0 %1785 }
0x1259   :  { %v1788_v16 = vmul.f32 %v4733_v6, %v1786_v15 }
0x125b   :  { %1790 = vrot.lane.b32.xlu0 %v1788_v16, %s4817_s18 }
0x126c   :  { %v1957_v17 = vpop.permute.xlu1 %1956 }
0x126d   :  { %v1959_v18 = vmul.f32 %v4737_v13, %v1957_v17 }
0x126f   :  { %1961 = vrot.lane.b32.xlu1 %v1959_v18, %s4817_s18 }
0x12cd   :  { %v1791_v20 = vpop.permute.xlu0 %1790 }
0x12ce   :  { %v5264_v21 = vadd.f32 %v1791_v20, %v1783_v19 }
0x12d0   :  { %4738 = vtanh.f32 %v5264_v21 }
0x12da   :  { %v4739_v22 = vpop.eup %4738 }
0x12db   :  { %1796 = vrot.lane.b32.xlu0 %v4739_v22, %s4816_s17 }
0x12e1   :  { %v1962_v24 = vpop.permute.xlu1 %1961 }
0x12e2   :  { %v5269_v46 = vadd.f32 %v1962_v24, %v1954_v23 }
0x12e4   :  { %4740 = vtanh.f32 %v5269_v46 }
0x12ee   :  { %v4741_v25 = vpop.eup %4740 }
0x12ef   :  { %1967 = vrot.lane.b32.xlu1 %v4741_v25, %s4816_s17 }
0x134d   :  { %v1797_v26 = vpop.permute.xlu0 %1796 }
0x134e   :  { %v1799_v27 = vmul.f32 %v4733_v6, %v1797_v26 }
0x1350   :  { %1972 = vrot.lane.b32.xlu0 %v1799_v27, %s4817_s18 }
0x1361   :  { %v1968_v29 = vpop.permute.xlu1 %1967 }
0x1362   :  { %v1970_v30 = vmul.f32 %v4737_v13, %v1968_v29 }
0x1364   :  { %2073 = vrot.lane.b32.xlu1 %v1970_v30, %s4817_s18  ;;  %v68_v30 = vld [vmem:[%s5565_s7 + $0x8] sm:$0xff] }
0x13c2   :  { %v1973_v31 = vpop.permute.xlu0 %1972 }
0x13c3   :  { %4231 = vmatmul.mubr.msk.f32.vlgmr.msra.gmra.mrb[20].mxu1 %vm238_vm3, %v1973_v31 }
0x13c4   :  { %4559 = vmatpush3.bf16.msra.mxu1 %v5024_v50  ;;  %4252 = vmatprep.mubr.msk.f32.mxu1 %vm4814_vm2, %v4815_v8 }
0x13c5   :  { %4560 = vmatprep.subr.bf16.mxu1 %v4813_v0 }
0x13c8   :  { %4562 = vmatpush3.bf16.msra.mxu1 %v5034_v54 }
0x13c9   :  { %4569 = vmatprep.subr.bf16.mxu1 %v4813_v0 }
0x13cb   :  { %4253 = vmatmul.mubr.msk.f32.vlgmr.msra.gmra.mrb[22].mxu1 %vm238_vm3, %v1973_v31  ;;  %v71_v31 = vld [vmem:[%s5566_s8] sm:$0xff] }
0x13cc   :  { %4571 = vmatpush3.bf16.msra.mxu1 %v5024_v50  ;;  %4274 = vmatprep.mubr.msk.f32.mxu1 %vm4814_vm2, %v4815_v8  ;;  %v4812_v50 = vld [vmem:[%s5561_s3] ss:$0 sm:$0xff] }
0x13cd   :  { %4572 = vmatprep.subr.bf16.mxu1 %v4813_v0 }
0x13d0   :  { %4574 = vmatpush3.bf16.msra.mxu1 %v5034_v54  ;;  %v235_v54 = vadd.f32 %v4812_v50, %v5048_v55  ;;  %v72_v50 = vld [vmem:[%s5566_s8 + $0x8] sm:$0xff] }
0x13d1   :  { %4581 = vmatprep.subr.bf16.mxu1 %v4813_v0 }
0x13d6   :  { %v2074_v32 = vpop.permute.xlu1 %2073 }
0x13d7   :  { %4242 = vmatmul.mubr.msk.f32.vlgmr.msra.gmra.mrb[26].mxu0 %vm238_vm3, %v2074_v32 }
0x13d8   :  { %4565 = vmatpush3.bf16.msra.mxu0 %v4971_v34  ;;  %4263 = vmatprep.mubr.msk.f32.mxu0 %vm4814_vm2, %v4815_v8 }
0x13d9   :  { %4566 = vmatprep.subr.bf16.mxu0 %v4813_v0 }
0x13dc   :  { %4568 = vmatpush3.bf16.msra.mxu0 %v4985_v38 }
0x13dd   :  { %4575 = vmatprep.subr.bf16.mxu0 %v4813_v0 }
0x1496   :  { %v2042_v33 = vpop.f32.mrb[20].mxu1 }
0x1497   :  { %v2046_v35 = vadd.f32 %v2042_v33, %v235_v54  ;;  %v4232_v36 = vpop.f32.mrb[21].mxu1  ;;  %v69_v54 = vld [vmem:[%s5565_s7 + $0x10] sm:$0xff]  ;;  %v70_v33 = vld [vmem:[%s5565_s7 + $0x18] sm:$0xff] }
0x1498   :  { %v73_v36 = vld [vmem:[%s5566_s8 + $0x10] sm:$0xff] }
0x1499   :  { %v3758_v28 = vmul.f32 -1.442695, %v2046_v35  ;;  %v5338_v35 = vpack.c.bf16 %v72_v50, %v71_v31 }
0x149b   :  { %4742 = vpow2.f32 %v3758_v28  ;;  %v74_v28 = vld [vmem:[%s5566_s8 + $0x18] sm:$0xff] }
0x149e   :  { %v2213_v34 = vpop.f32.mrb[22].mxu1 }
0x149f   :  { %v4254_v47 = vpop.f32.mrb[23].mxu1 }
0x14a0   :  { %v5348_v47 = vpack.c.bf16 %v74_v28, %v73_v36 }
0x14a5   :  { %v4743_v37 = vpop.eup %4742 }
0x14a6   :  { %v2050_v39 = vadd.f32 1.0, %v4743_v37 }
0x14a8   :  { %4744 = vrcp.f32 %v2050_v39 }
0x14aa   :  { %v2143_v40 = vpop.f32.mrb[26].mxu0 }
0x14ab   :  { %v2214_v38 = vadd.f32 %v2213_v34, %v2143_v40  ;;  %v4243_v41 = vpop.f32.mrb[27].mxu0  ;;  %v4579_v34 = vpack.c.bf16 %v70_v33, %v69_v54 }
0x14ad   :  { %v2217_v42 = vadd.f32 %v5057_v1, %v2214_v38 }
0x14af   :  { %v3762_v43 = vmul.f32 -1.442695, %v2217_v42 }
0x14b1   :  { %4746 = vpow2.f32 %v3762_v43  ;;  %v3768_v43 = vld [vmem:[%s5567_s9] ss:$0 sm:$0xff] }
0x14b2   :  { %v4745_v48 = vpop.eup %4744 }
0x14b3   :  { %v2053_v49 = vmul.f32 2.0, %v4745_v48  ;;  %v2055_v62 = vmul.f32 %v4745_v48, %v5264_v21 }
0x14b5   :  { %v3759_v55 = vadd.f32 -1.0, %v2053_v49 }
0x14b7   :  { %2057 = vrot.lane.b32.xlu0 %v3759_v55, %s4816_s17 }
0x14bb   :  { %v4747_v51 = vpop.eup %4746 }
0x14bc   :  { %v2221_v52 = vadd.f32 1.0, %v4747_v51 }
0x14be   :  { %4748 = vrcp.f32 %v2221_v52 }
0x14c8   :  { %v4749_v44 = vpop.eup %4748 }
0x14c9   :  { %v2224_v53 = vmul.f32 2.0, %v4749_v44  ;;  %v2226_v45 = vmul.f32 %v4749_v44, %v5269_v46 }
0x14cb   :  { %v3763_v57 = vadd.f32 -1.0, %v2224_v53 }
0x14cd   :  { %2228 = vrot.lane.b32.xlu1 %v3763_v57, %s4816_s17 }
0x1529   :  { %v2058_v58 = vpop.permute.xlu0 %2057 }
0x152a   :  { %v2060_v59 = vmul.f32 %v4745_v48, %v2058_v58 }
0x152c   :  { %2062 = vrot.lane.b32.xlu0 %v2060_v59, %s4817_s18 }
0x153f   :  { %v2229_v60 = vpop.permute.xlu1 %2228 }
0x1540   :  { %v2231_v61 = vmul.f32 %v4749_v44, %v2229_v60 }
0x1542   :  { %2233 = vrot.lane.b32.xlu1 %v2231_v61, %s4817_s18 }
0x159e   :  { %v2063_v4 = vpop.permute.xlu0 %2062 }
0x159f   :  { %v2065_v63 = vadd.f32 %v2063_v4, %v2055_v62 }
0x15a1   :  { %4750 = vtanh.f32 %v2065_v63 }
0x15ab   :  { %v4751_v2 = vpop.eup %4750 }
0x15ac   :  { %2068 = vrot.lane.b32.xlu0 %v4751_v2, %s4816_s17 }
0x15b4   :  { %v2234_v3 = vpop.permute.xlu1 %2233 }
0x15b5   :  { %v2236_v10 = vadd.f32 %v2234_v3, %v2226_v45  ;;  %v80_v45 = vld [vmem:[%s5568_s11] sm:$0xff]  ;;  %v81_v3 = vld [vmem:[%s5568_s11 + $0x8] sm:$0xff] }
0x15b7   :  { %4752 = vtanh.f32 %v2236_v10 }
0x15c1   :  { %v4753_v5 = vpop.eup %4752 }
0x15c2   :  { %2239 = vrot.lane.b32.xlu1 %v4753_v5, %s4816_s17  ;;  %v82_v5 = vld [vmem:[%s5568_s11 + $0x10] sm:$0xff] }
0x161e   :  { %v2069_v6 = vpop.permute.xlu0 %2068 }
0x161f   :  { %v2071_v7 = vmul.f32 %v4745_v48, %v2069_v6  ;;  %v83_v6 = vld [vmem:[%s5568_s11 + $0x18] sm:$0xff] }
0x1621   :  { %2319 = vrot.lane.b32.xlu1 %v2071_v7, %s4817_s18  ;;  %v5394_v7 = vpack.c.bf16 %v83_v6, %v82_v5 }
0x1634   :  { %v2240_v12 = vpop.permute.xlu1 %2239 }
0x1635   :  { %v2242_v56 = vmul.f32 %v4749_v44, %v2240_v12 }
0x1637   :  { %2244 = vrot.lane.b32.xlu0 %v2242_v56, %s4817_s18 }
0x1693   :  { %v2320_v9 = vpop.permute.xlu1 %2319 }
0x1694   :  { %4275 = vmatmul.mubr.msk.f32.vlgmr.msra.gmra.mrb[24].mxu1 %vm238_vm3, %v2320_v9  ;;  %v76_v9 = vld [vmem:[%s5569_s10] sm:$0xff] }
0x1695   :  { %4296 = vmatprep.mubr.msk.f32.mxu1 %vm4814_vm2, %v4815_v8  ;;  %4583 = vmatpush3.bf16.msra.mxu1 %v5338_v35 }
0x1696   :  { %4584 = vmatprep.subr.bf16.mxu1 %v4813_v0 }
0x1699   :  { %4586 = vmatpush3.bf16.msra.mxu1 %v5348_v47 }
0x169a   :  { %4593 = vmatprep.subr.bf16.mxu1 %v4813_v0 }
0x169c   :  { %4297 = vmatmul.mubr.f32.vlgmr.msra.gmra.mrb[26].mxu1 %v4815_v8 }
0x169d   :  { %4318 = vmatprep.mubr.msk.f32.mxu1 %vm4814_vm2, %v4815_v8 }
0x16a9   :  { %v2245_v13 = vpop.permute.xlu0 %2244 }
0x16aa   :  { %4264 = vmatmul.mubr.msk.f32.vlgmr.msra.gmra.mrb[28].mxu0 %vm238_vm3, %v2245_v13  ;;  %v77_v13 = vld [vmem:[%s5569_s10 + $0x8] sm:$0xff] }
0x16ab   :  { %4285 = vmatprep.mubr.msk.f32.mxu0 %vm4814_vm2, %v4815_v8 }
0x1767   :  { %v2389_v11 = vpop.f32.mrb[24].mxu1 }
0x1768   :  { %v4276_v14 = vpop.f32.mrb[25].mxu1 }
0x1769   :  { %v78_v14 = vld [vmem:[%s5569_s10 + $0x10] sm:$0xff] }
0x176f   :  { %v2566_v41 = vpop.f32.mrb[26].mxu1 }
0x1770   :  { %v4298_v42 = vpop.f32.mrb[27].mxu1 }
0x177d   :  { %v2314_v15 = vpop.f32.mrb[28].mxu0 }
0x177e   :  { %v2390_v16 = vadd.f32 %v2389_v11, %v2314_v15  ;;  %v4265_v17 = vpop.f32.mrb[29].mxu0  ;;  %v5412_v11 = vpack.c.bf16 %v77_v13, %v76_v9  ;;  %v79_v15 = vld [vmem:[%s5569_s10 + $0x18] sm:$0xff] }
0x177f   :  { %v5422_v17 = vpack.c.bf16 %v79_v15, %v78_v14 }
0x1780   :  { %v2393_v18 = vadd.f32 %v5057_v1, %v2390_v16  ;;  %v67_v1 = vld [vmem:[%s5565_s7] sm:$0xff] }
0x1781   :  { %v4576_v32 = vpack.c.bf16 %v68_v30, %v67_v1 }
0x1782   :  { %v3766_v19 = vmul.f32 -1.442695, %v2393_v18 }
0x1783   :  { %4577 = vmatpush3.bf16.msra.mxu0 %v4576_v32 }
0x1784   :  { %4754 = vpow2.f32 %v3766_v19  ;;  %4578 = vmatprep.subr.bf16.mxu0 %v4813_v0 }
0x1787   :  { %4580 = vmatpush3.bf16.msra.mxu0 %v4579_v34 }
0x1788   :  { %4587 = vmatprep.subr.bf16.mxu0 %v4813_v0 }
0x178e   :  { %v4755_v20 = vpop.eup %4754 }
0x178f   :  { %v2397_v21 = vadd.f32 1.0, %v4755_v20 }
0x1791   :  { %4756 = vrcp.f32 %v2397_v21 }
0x179b   :  { %v4757_v22 = vpop.eup %4756 }
0x179c   :  { %v2400_v23 = vmul.f32 2.0, %v4757_v22  ;;  %v2402_v26 = vmul.f32 %v4757_v22, %v2236_v10  ;;  %v5384_v10 = vpack.c.bf16 %v81_v3, %v80_v45 }
0x179e   :  { %v3767_v24 = vadd.f32 -1.0, %v2400_v23  ;;  %4595 = vmatpush3.bf16.msra.mxu1 %v5384_v10 }
0x179f   :  { %4596 = vmatprep.subr.bf16.mxu1 %v4813_v0 }
0x17a0   :  { %2404 = vrot.lane.b32.xlu0 %v3767_v24, %s4816_s17 }
0x17a2   :  { %4598 = vmatpush3.bf16.msra.mxu1 %v5394_v7 }
0x17a3   :  { %4605 = vmatprep.subr.bf16.mxu1 %v4813_v0 }
0x17a5   :  { %4319 = vmatmul.mubr.f32.vlgmr.msra.gmra.mrb[28].mxu1 %v4815_v8 }
0x17a6   :  { %4607 = vmatpush3.bf16.msra.mxu1 %v5338_v35  ;;  %4340 = vmatprep.mubr.msk.f32.mxu1 %vm4814_vm2, %v4815_v8 }
0x17a7   :  { %4608 = vmatprep.subr.bf16.mxu1 %v4813_v0 }
0x17aa   :  { %4610 = vmatpush3.bf16.msra.mxu1 %v5348_v47 }
0x17ab   :  { %4617 = vmatprep.subr.bf16.mxu1 %v4813_v0 }
0x1812   :  { %v2405_v46 = vpop.permute.xlu0 %2404 }
0x1813   :  { %v2407_v25 = vmul.f32 %v4757_v22, %v2405_v46  ;;  %v5440_v46 = vld [vmem:[%s5570_s12] ss:$0 sm:$0xff] }
0x1815   :  { %2409 = vrot.lane.b32.xlu1 %v2407_v25, %s4817_s18 }
0x1878   :  { %v2769_v18 = vpop.f32.mrb[28].mxu1 }
0x1879   :  { %v4320_v19 = vpop.f32.mrb[29].mxu1 }
0x1887   :  { %v2410_v27 = vpop.permute.xlu1 %2409 }
0x1888   :  { %v2412_v29 = vadd.f32 %v2410_v27, %v2402_v26 }
0x188a   :  { %4758 = vtanh.f32 %v2412_v29 }
0x1894   :  { %v4759_v37 = vpop.eup %4758 }
0x1895   :  { %2415 = vrot.lane.b32.xlu0 %v4759_v37, %s4816_s17 }
0x1907   :  { %v2416_v39 = vpop.permute.xlu0 %2415 }
0x1908   :  { %v2418_v40 = vmul.f32 %v4757_v22, %v2416_v39 }
0x190a   :  { %2426 = vrot.lane.b32.xlu1 %v2418_v40, %s4817_s18 }
0x197c   :  { %v2427_v38 = vpop.permute.xlu1 %2426 }
0x197d   :  { %4286 = vmatmul.mubr.msk.f32.vlgmr.msra.gmra.mrb[30].mxu0 %vm238_vm3, %v2427_v38 }
0x197e   :  { %4589 = vmatpush3.bf16.msra.mxu0 %v5338_v35  ;;  %4307 = vmatprep.mubr.msk.f32.mxu0 %vm4814_vm2, %v4815_v8 }
0x197f   :  { %4590 = vmatprep.subr.bf16.mxu0 %v4813_v0 }
0x1982   :  { %4592 = vmatpush3.bf16.msra.mxu0 %v5348_v47 }
0x1983   :  { %4599 = vmatprep.subr.bf16.mxu0 %v4813_v0 }
0x1a50   :  { %v2496_v48 = vpop.f32.mrb[30].mxu0 }
0x1a51   :  { %v5369_v49 = vadd.f32 %v3768_v43, %v2496_v48  ;;  %v4287_v55 = vpop.f32.mrb[31].mxu0 }
0x1a53   :  { %v2570_v51 = vadd.f32 %v2566_v41, %v5369_v49 }
0x1a55   :  { %v3770_v52 = vmul.f32 -1.442695, %v2570_v51 }
0x1a57   :  { %4760 = vpow2.f32 %v3770_v52 }
0x1a61   :  { %v4761_v44 = vpop.eup %4760 }
0x1a62   :  { %v2574_v53 = vadd.f32 1.0, %v4761_v44 }
0x1a64   :  { %4762 = vrcp.f32 %v2574_v53 }
0x1a6e   :  { %v4763_v57 = vpop.eup %4762 }
0x1a6f   :  { %v2577_v58 = vmul.f32 2.0, %v4763_v57  ;;  %v2579_v62 = vmul.f32 0.0, %v4763_v57 }
0x1a71   :  { %v3771_v59 = vadd.f32 -1.0, %v2577_v58 }
0x1a73   :  { %2581 = vrot.lane.b32.xlu0 %v3771_v59, %s4816_s17 }
0x1ae5   :  { %v2582_v60 = vpop.permute.xlu0 %2581 }
0x1ae6   :  { %v2584_v61 = vmul.f32 %v4763_v57, %v2582_v60 }
0x1ae8   :  { %2586 = vrot.lane.b32.xlu1 %v2584_v61, %s4817_s18 }
0x1b5a   :  { %v2587_v4 = vpop.permute.xlu1 %2586 }
0x1b5b   :  { %v5374_v63 = vadd.f32 %v2587_v4, %v2579_v62 }
0x1b5d   :  { %4764 = vtanh.f32 %v5374_v63  ;;  %v2684_v42 = vrot.slane %v5374_v63, 6 }
0x1b67   :  { %v4765_v2 = vpop.eup %4764 }
0x1b68   :  { %2592 = vrot.lane.b32.xlu0 %v4765_v2, %s4816_s17 }
0x1bda   :  { %v2593_v12 = vpop.permute.xlu0 %2592 }
0x1bdb   :  { %v2595_v56 = vmul.f32 %v4763_v57, %v2593_v12 }
0x1bdd   :  { %2597 = vrot.lane.b32.xlu1 %v2595_v56, %s4817_s18 }
0x1c4f   :  { %v2598_v16 = vpop.permute.xlu1 %2597 }
0x1c50   :  { %4308 = vmatmul.mubr.msk.f32.vlgmr.msra.gmra.mrb[32].mxu0 %vm238_vm3, %v2598_v16 }
0x1c51   :  { %4601 = vmatpush3.bf16.msra.mxu0 %v5412_v11  ;;  %4329 = vmatprep.mubr.msk.f32.mxu0 %vm4814_vm2, %v4815_v8 }
0x1c52   :  { %4602 = vmatprep.subr.bf16.mxu0 %v4813_v0 }
0x1c55   :  { %4604 = vmatpush3.bf16.msra.mxu0 %v5422_v17 }
0x1c56   :  { %4611 = vmatprep.subr.bf16.mxu0 %v4813_v0 }
0x1c58   :  { %4330 = vmatmul.mubr.msk.f32.vlgmr.msra.gmra.mrb[34].mxu0 %vm238_vm3, %v2598_v16 }
0x1c59   :  { %4613 = vmatpush3.bf16.msra.mxu0 %v5384_v10  ;;  %4351 = vmatprep.mubr.msk.f32.mxu0 %vm4814_vm2, %v4815_v8 }
0x1c5a   :  { %4614 = vmatprep.subr.bf16.mxu0 %v4813_v0 }
0x1c5d   :  { %4616 = vmatpush3.bf16.msra.mxu0 %v5394_v7 }
0x1c5e   :  { %4623 = vmatprep.subr.bf16.mxu0 %v4813_v0 }
0x1d23   :  { %v2667_v20 = vpop.f32.mrb[32].mxu0 }
0x1d24   :  { %v2672_v21 = vrot.slane %v2667_v20, 6  ;;  %v4309_v22 = vpop.f32.mrb[33].mxu0 }
0x1d26   :  { %v2674_v23 = vadd.f32 %v2672_v21, %v5369_v49 }
0x1d28   :  { %v3773_v24 = vmul.f32 -1.442695, %v2674_v23 }
0x1d2a   :  { %4766 = vpow2.f32 %v3773_v24 }
0x1d2b   :  { %v2839_v25 = vpop.f32.mrb[34].mxu0 }
0x1d2c   :  { %v2840_v26 = vadd.f32 %v2839_v25, %v2769_v18  ;;  %v4331_v27 = vpop.f32.mrb[35].mxu0 }
0x1d2e   :  { %v2849_v29 = vadd.f32 %v5440_v46, %v2840_v26 }
0x1d30   :  { %v3777_v1 = vmul.f32 -1.442695, %v2849_v29 }
0x1d32   :  { %4768 = vpow2.f32 %v3777_v1 }
0x1d34   :  { %v4767_v30 = vpop.eup %4766 }
0x1d35   :  { %v2678_v31 = vadd.f32 1.0, %v4767_v30 }
0x1d37   :  { %4770 = vrcp.f32 %v2678_v31 }
0x1d3c   :  { %v4769_v32 = vpop.eup %4768 }
0x1d3d   :  { %v2853_v50 = vadd.f32 1.0, %v4769_v32 }
0x1d3f   :  { %4772 = vrcp.f32 %v2853_v50 }
0x1d41   :  { %v4771_v54 = vpop.eup %4770 }
0x1d42   :  { %v2681_v33 = vmul.f32 2.0, %v4771_v54  ;;  %v2686_v43 = vmul.f32 %v4771_v54, %v2684_v42 }
0x1d44   :  { %v3774_v36 = vadd.f32 -1.0, %v2681_v33 }
0x1d46   :  { %2688 = vrot.lane.b32.xlu0 %v3774_v36, %s4816_s17 }
0x1d49   :  { %v4773_v28 = vpop.eup %4772 }
0x1d4a   :  { %v2856_v34 = vmul.f32 2.0, %v4773_v28  ;;  %v2858_v51 = vmul.f32 0.0, %v4773_v28 }
0x1d4c   :  { %v3778_v37 = vadd.f32 -1.0, %v2856_v34 }
0x1d4e   :  { %2860 = vrot.lane.b32.xlu1 %v3778_v37, %s4816_s17 }
0x1db8   :  { %v2689_v39 = vpop.permute.xlu0 %2688 }
0x1db9   :  { %v2691_v40 = vmul.f32 %v4771_v54, %v2689_v39 }
0x1dbb   :  { %2693 = vrot.lane.b32.xlu0 %v2691_v40, %s4817_s18 }
0x1dc0   :  { %v2861_v38 = vpop.permute.xlu1 %2860 }
0x1dc1   :  { %v2863_v41 = vmul.f32 %v4773_v28, %v2861_v38 }
0x1dc3   :  { %2865 = vrot.lane.b32.xlu1 %v2863_v41, %s4817_s18 }
0x1e2d   :  { %v2694_v48 = vpop.permute.xlu0 %2693 }
0x1e2e   :  { %v5448_v55 = vadd.f32 %v2694_v48, %v2686_v43 }
0x1e30   :  { %4774 = vtanh.f32 %v5448_v55  ;;  %v2964_v30 = vrot.slane %v5448_v55, 6 }
0x1e35   :  { %v2866_v52 = vpop.permute.xlu1 %2865 }
0x1e36   :  { %v5451_v44 = vadd.f32 %v2866_v52, %v2858_v51 }
0x1e38   :  { %4776 = vtanh.f32 %v5451_v44 }
0x1e3a   :  { %v4775_v53 = vpop.eup %4774 }
0x1e3b   :  { %2699 = vrot.lane.b32.xlu0 %v4775_v53, %s4816_s17 }
0x1e42   :  { %v4777_v57 = vpop.eup %4776 }
0x1e43   :  { %2871 = vrot.lane.b32.xlu1 %v4777_v57, %s4816_s17 }
0x1ead   :  { %v2700_v58 = vpop.permute.xlu0 %2699 }
0x1eae   :  { %v2702_v59 = vmul.f32 %v4771_v54, %v2700_v58 }
0x1eb0   :  { %v2876_v60 = vrot.slane %v2702_v59, 2 }
0x1eb2   :  { %2877 = vrot.lane.b32.xlu0 %v2876_v60, %s4817_s18 }
0x1eb5   :  { %v2872_v61 = vpop.permute.xlu1 %2871 }
0x1eb6   :  { %v2874_v62 = vmul.f32 %v4773_v28, %v2872_v61 }
0x1eb8   :  { %2984 = vrot.lane.b32.xlu1 %v2874_v62, %s4817_s18 }
0x1f24   :  { %v2878_v4 = vpop.permute.xlu0 %2877 }
0x1f25   :  { %4341 = vmatmul.mubr.msk.f32.vlgmr.msra.gmra.mrb[30].mxu1 %vm238_vm3, %v2878_v4 }
0x1f26   :  { %4619 = vmatpush3.bf16.msra.mxu1 %v5412_v11  ;;  %4362 = vmatprep.mubr.msk.f32.mxu1 %vm4814_vm2, %v4815_v8 }
0x1f27   :  { %4620 = vmatprep.subr.bf16.mxu1 %v4813_v0 }
0x1f2a   :  { %4622 = vmatpush3.bf16.msra.mxu1 %v5422_v17  ;;  %v2985_v63 = vpop.permute.xlu1 %2984 }
0x1f2b   :  { %4352 = vmatmul.mubr.msk.f32.vlgmr.msra.gmra.mrb[36].mxu0 %vm238_vm3, %v2985_v63  ;;  %4629 = vmatprep.subr.bf16.mxu1 %v4813_v0 }
0x1f2c   :  { %4625 = vmatpush3.bf16.msra.mxu0 %v5338_v35  ;;  %4373 = vmatprep.mubr.msk.f32.mxu0 %vm4814_vm2, %v4815_v8 }
0x1f2d   :  { %4363 = vmatmul.mubr.msk.f32.vlgmr.msra.gmra.mrb[32].mxu1 %vm238_vm3, %v2878_v4  ;;  %4626 = vmatprep.subr.bf16.mxu0 %v4813_v0 }
0x1f2e   :  { %4631 = vmatpush3.bf16.msra.mxu1 %v5384_v10  ;;  %4384 = vmatprep.mubr.msk.f32.mxu1 %vm4814_vm2, %v4815_v8 }
0x1f2f   :  { %4632 = vmatprep.subr.bf16.mxu1 %v4813_v0 }
0x1f30   :  { %4628 = vmatpush3.bf16.msra.mxu0 %v5348_v47 }
0x1f31   :  { %4635 = vmatprep.subr.bf16.mxu0 %v4813_v0 }
0x1f32   :  { %4634 = vmatpush3.bf16.msra.mxu1 %v5394_v7 }
0x1f33   :  { %4641 = vmatprep.subr.bf16.mxu1 %v4813_v0 }
0x1ff8   :  { %v2947_v35 = vpop.f32.mrb[30].mxu1 }
0x1ff9   :  { %v2952_v2 = vrot.slane %v2947_v35, 4  ;;  %v4342_v45 = vpop.f32.mrb[31].mxu1 }
0x1ffb   :  { %v2954_v3 = vadd.f32 %v2952_v2, %v5369_v49 }
0x1ffd   :  { %v3780_v5 = vmul.f32 -1.442695, %v2954_v3 }
0x1ffe   :  { %v3054_v6 = vpop.f32.mrb[36].mxu0 }
0x1fff   :  { %4778 = vpow2.f32 %v3780_v5  ;;  %v4353_v12 = vpop.f32.mrb[37].mxu0 }
0x2000   :  { %v3124_v56 = vpop.f32.mrb[32].mxu1 }
0x2001   :  { %v3125_v9 = vadd.f32 %v3124_v56, %v3054_v6  ;;  %v4364_v13 = vpop.f32.mrb[33].mxu1 }
0x2003   :  { %v3128_v47 = vadd.f32 %v5440_v46, %v3125_v9 }
0x2005   :  { %v3784_v14 = vmul.f32 -1.442695, %v3128_v47 }
0x2007   :  { %4780 = vpow2.f32 %v3784_v14 }
0x2009   :  { %v4779_v15 = vpop.eup %4778 }
0x200a   :  { %v2958_v16 = vadd.f32 1.0, %v4779_v15 }
0x200c   :  { %4782 = vrcp.f32 %v2958_v16 }
0x2011   :  { %v4781_v18 = vpop.eup %4780 }
0x2012   :  { %v3132_v19 = vadd.f32 1.0, %v4781_v18 }
0x2014   :  { %4784 = vrcp.f32 %v3132_v19 }
0x2016   :  { %v4783_v20 = vpop.eup %4782 }
0x2017   :  { %v2961_v21 = vmul.f32 2.0, %v4783_v20  ;;  %v2966_v31 = vmul.f32 %v4783_v20, %v2964_v30 }
0x2019   :  { %v3781_v22 = vadd.f32 -1.0, %v2961_v21 }
0x201b   :  { %2968 = vrot.lane.b32.xlu0 %v3781_v22, %s4816_s17 }
0x201e   :  { %v4785_v23 = vpop.eup %4784 }
0x201f   :  { %v3135_v24 = vmul.f32 2.0, %v4785_v23  ;;  %v3137_v54 = vmul.f32 %v4785_v23, %v5451_v44 }
0x2021   :  { %v3785_v25 = vadd.f32 -1.0, %v3135_v24 }
0x2023   :  { %3139 = vrot.lane.b32.xlu1 %v3785_v25, %s4816_s17 }
0x208d   :  { %v2969_v26 = vpop.permute.xlu0 %2968 }
0x208e   :  { %v2971_v27 = vmul.f32 %v4783_v20, %v2969_v26 }
0x2090   :  { %2973 = vrot.lane.b32.xlu0 %v2971_v27, %s4817_s18 }
0x2095   :  { %v3140_v29 = vpop.permute.xlu1 %3139 }
0x2096   :  { %v3142_v1 = vmul.f32 %v4785_v23, %v3140_v29 }
0x2098   :  { %3144 = vrot.lane.b32.xlu1 %v3142_v1, %s4817_s18 }
0x2102   :  { %v2974_v32 = vpop.permute.xlu0 %2973 }
0x2103   :  { %v5486_v50 = vadd.f32 %v2974_v32, %v2966_v31 }
0x2105   :  { %4786 = vtanh.f32 %v5486_v50  ;;  %v3243_v56 = vrot.slane %v5486_v50, 6 }
0x210a   :  { %v3145_v33 = vpop.permute.xlu1 %3144 }
0x210b   :  { %v5490_v36 = vadd.f32 %v3145_v33, %v3137_v54 }
0x210d   :  { %4788 = vtanh.f32 %v5490_v36 }
0x210f   :  { %v4787_v28 = vpop.eup %4786 }
0x2110   :  { %2979 = vrot.lane.b32.xlu0 %v4787_v28, %s4816_s17 }
0x2117   :  { %v4789_v34 = vpop.eup %4788 }
0x2118   :  { %3150 = vrot.lane.b32.xlu1 %v4789_v34, %s4816_s17 }
0x2182   :  { %v2980_v37 = vpop.permute.xlu0 %2979 }
0x2183   :  { %v2982_v39 = vmul.f32 %v4783_v20, %v2980_v37 }
0x2185   :  { %v3155_v40 = vrot.slane %v2982_v39, 4 }
0x2187   :  { %3156 = vrot.lane.b32.xlu0 %v3155_v40, %s4817_s18 }
0x218a   :  { %v3151_v38 = vpop.permute.xlu1 %3150 }
0x218b   :  { %v3153_v41 = vmul.f32 %v4785_v23, %v3151_v38 }
0x218d   :  { %3263 = vrot.lane.b32.xlu1 %v3153_v41, %s4817_s18  ;;  %v86_v41 = vld [vmem:[%s5571_s13 + $0x8] sm:$0xff] }
0x21f9   :  { %v3157_v42 = vpop.permute.xlu0 %3156 }
0x21fa   :  { %4374 = vmatmul.mubr.msk.f32.vlgmr.msra.gmra.mrb[38].mxu0 %vm238_vm3, %v3157_v42 }
0x21fb   :  { %4637 = vmatpush3.bf16.msra.mxu0 %v5412_v11  ;;  %4395 = vmatprep.mubr.msk.f32.mxu0 %vm4814_vm2, %v4815_v8 }
0x21fc   :  { %4638 = vmatprep.subr.bf16.mxu0 %v4813_v0 }
0x21ff   :  { %4640 = vmatpush3.bf16.msra.mxu0 %v5422_v17  ;;  %v3264_v43 = vpop.permute.xlu1 %3263 }
0x2200   :  { %4385 = vmatmul.mubr.msk.f32.vlgmr.msra.gmra.mrb[34].mxu1 %vm238_vm3, %v3264_v43  ;;  %4647 = vmatprep.subr.bf16.mxu0 %v4813_v0 }
0x2201   :  { %4643 = vmatpush3.bf16.msra.mxu1 %v5384_v10  ;;  %4406 = vmatprep.mubr.msk.f32.mxu1 %vm4814_vm2, %v4815_v8 }
0x2202   :  { %4396 = vmatmul.mubr.msk.f32.vlgmr.msra.gmra.mrb[40].mxu0 %vm238_vm3, %v3157_v42  ;;  %4644 = vmatprep.subr.bf16.mxu1 %v4813_v0  ;;  %v87_v42 = vld [vmem:[%s5571_s13 + $0x10] sm:$0xff] }
0x2203   :  { %4649 = vmatpush3.bf16.msra.mxu0 %v5412_v11  ;;  %4417 = vmatprep.mubr.msk.f32.mxu0 %vm4814_vm2, %v4815_v8 }
0x2204   :  { %4650 = vmatprep.subr.bf16.mxu0 %v4813_v0 }
0x2205   :  { %4646 = vmatpush3.bf16.msra.mxu1 %v5394_v7 }
0x2206   :  { %4653 = vmatprep.subr.bf16.mxu1 %v4813_v0 }
0x2207   :  { %4652 = vmatpush3.bf16.msra.mxu0 %v5422_v17 }
0x22cd   :  { %v3226_v10 = vpop.f32.mrb[38].mxu0 }
0x22ce   :  { %v3231_v48 = vrot.slane %v3226_v10, 2  ;;  %v4375_v55 = vpop.f32.mrb[39].mxu0  ;;  %v88_v10 = vld [vmem:[%s5571_s13 + $0x18] sm:$0xff] }
0x22d0   :  { %v3233_v51 = vadd.f32 %v3231_v48, %v5369_v49  ;;  %v4657_v48 = vpack.c.bf16 %v88_v10, %v87_v42 }
0x22d2   :  { %v3787_v52 = vmul.f32 -1.442695, %v3233_v51  ;;  %v20_v51 = vstv %s5572_s14 }
0x22d3   :  { %v3333_v44 = vpop.f32.mrb[34].mxu1  ;;  %21 = vst [vmem:[#allocation2] sm:$0x1] %v20_v51 }
0x22d4   :  { %4790 = vpow2.f32 %v3787_v52  ;;  %v4386_v11 = vpop.f32.mrb[35].mxu1 }
0x22d5   :  { %v3403_v53 = vpop.f32.mrb[40].mxu0 }
0x22d6   :  { %v3404_v57 = vadd.f32 %v3403_v53, %v3333_v44  ;;  %v4397_v58 = vpop.f32.mrb[41].mxu0 }
0x22d8   :  { %v3407_v59 = vadd.f32 %v5440_v46, %v3404_v57 }
0x22da   :  { %v3791_v60 = vmul.f32 -1.442695, %v3407_v59  ;;  %v3797_v53 = vld [vmem:[#allocation2] ss:$0 sm:$0xff] }
0x22dc   :  { %4792 = vpow2.f32 %v3791_v60 }
0x22de   :  { %v4791_v7 = vpop.eup %4790 }
0x22df   :  { %v3237_v61 = vadd.f32 1.0, %v4791_v7 }
0x22e1   :  { %4794 = vrcp.f32 %v3237_v61 }
0x22e6   :  { %v4793_v17 = vpop.eup %4792 }
0x22e7   :  { %v3411_v62 = vadd.f32 1.0, %v4793_v17 }
0x22e9   :  { %4796 = vrcp.f32 %v3411_v62 }
0x22eb   :  { %v4795_v4 = vpop.eup %4794 }
0x22ec   :  { %v3240_v63 = vmul.f32 2.0, %v4795_v4  ;;  %v3245_v9 = vmul.f32 %v4795_v4, %v3243_v56 }
0x22ee   :  { %v3788_v49 = vadd.f32 -1.0, %v3240_v63 }
0x22f0   :  { %3247 = vrot.lane.b32.xlu0 %v3788_v49, %s4816_s17 }
0x22f3   :  { %v4797_v35 = vpop.eup %4796 }
0x22f4   :  { %v3414_v2 = vmul.f32 2.0, %v4797_v35  ;;  %v3416_v14 = vmul.f32 %v4797_v35, %v5490_v36 }
0x22f6   :  { %v3792_v45 = vadd.f32 -1.0, %v3414_v2 }
0x22f8   :  { %3418 = vrot.lane.b32.xlu1 %v3792_v45, %s4816_s17 }
0x2362   :  { %v3248_v3 = vpop.permute.xlu0 %3247 }
0x2363   :  { %v3250_v5 = vmul.f32 %v4795_v4, %v3248_v3 }
0x2365   :  { %3252 = vrot.lane.b32.xlu0 %v3250_v5, %s4817_s18 }
0x236a   :  { %v3419_v6 = vpop.permute.xlu1 %3418 }
0x236b   :  { %v3421_v12 = vmul.f32 %v4797_v35, %v3419_v6 }
0x236d   :  { %3423 = vrot.lane.b32.xlu1 %v3421_v12, %s4817_s18 }
0x23d7   :  { %v3253_v13 = vpop.permute.xlu0 %3252 }
0x23d8   :  { %v3255_v47 = vadd.f32 %v3253_v13, %v3245_v9 }
0x23da   :  { %4798 = vtanh.f32 %v3255_v47 }
0x23df   :  { %v3424_v15 = vpop.permute.xlu1 %3423 }
0x23e0   :  { %v3426_v16 = vadd.f32 %v3424_v15, %v3416_v14 }
0x23e2   :  { %4800 = vtanh.f32 %v3426_v16 }
0x23e4   :  { %v4799_v18 = vpop.eup %4798 }
0x23e5   :  { %3258 = vrot.lane.b32.xlu0 %v4799_v18, %s4816_s17 }
0x23ec   :  { %v4801_v19 = vpop.eup %4800 }
0x23ed   :  { %3429 = vrot.lane.b32.xlu1 %v4801_v19, %s4816_s17 }
0x2457   :  { %v3259_v20 = vpop.permute.xlu0 %3258 }
0x2458   :  { %v3261_v21 = vmul.f32 %v4795_v4, %v3259_v20 }
0x245a   :  { %v3509_v22 = vrot.slane %v3261_v21, 6 }
0x245c   :  { %3510 = vrot.lane.b32.xlu1 %v3509_v22, %s4817_s18 }
0x245f   :  { %v3430_v23 = vpop.permute.xlu1 %3429 }
0x2460   :  { %v3432_v24 = vmul.f32 %v4797_v35, %v3430_v23 }
0x2462   :  { %3434 = vrot.lane.b32.xlu0 %v3432_v24, %s4817_s18 }
0x24ce   :  { %v3511_v25 = vpop.permute.xlu1 %3510 }
0x24cf   :  { %4418 = vmatmul.mubr.msk.f32.vlgmr.msra.gmra.mrb[42].mxu0 %vm238_vm3, %v3511_v25 }
0x24d4   :  { %v3435_v26 = vpop.permute.xlu0 %3434 }
0x24d5   :  { %4407 = vmatmul.mubr.msk.f32.vlgmr.msra.gmra.mrb[36].mxu1 %vm238_vm3, %v3435_v26 }
0x24d6   :  { %4428 = vmatprep.mubr.msk.f32.mxu1 %vm4814_vm2, %v4815_v8 }
0x25a2   :  { %v3580_v27 = vpop.f32.mrb[42].mxu0 }
0x25a3   :  { %v4419_v29 = vpop.f32.mrb[43].mxu0 }
0x25a8   :  { %v3504_v1 = vpop.f32.mrb[36].mxu1 }
0x25a9   :  { %v3581_v30 = vadd.f32 %v3580_v27, %v3504_v1  ;;  %v4408_v31 = vpop.f32.mrb[37].mxu1 }
0x25ab   :  { %v3584_v32 = vadd.f32 %v5440_v46, %v3581_v30  ;;  %v85_v46 = vld [vmem:[%s5571_s13] sm:$0xff] }
0x25ac   :  { %v4654_v43 = vpack.c.bf16 %v86_v41, %v85_v46 }
0x25ad   :  { %v3795_v50 = vmul.f32 -1.442695, %v3584_v32 }
0x25ae   :  { %4655 = vmatpush3.bf16.msra.mxu1 %v4654_v43 }
0x25af   :  { %4802 = vpow2.f32 %v3795_v50  ;;  %4656 = vmatprep.subr.bf16.mxu1 %v4813_v0 }
0x25b2   :  { %4658 = vmatpush3.bf16.msra.mxu1 %v4657_v48 }
0x25b9   :  { %v4803_v54 = vpop.eup %4802 }
0x25ba   :  { %v3588_v33 = vadd.f32 1.0, %v4803_v54 }
0x25bc   :  { %4804 = vrcp.f32 %v3588_v33 }
0x25c6   :  { %v4805_v36 = vpop.eup %4804 }
0x25c7   :  { %v3591_v28 = vmul.f32 2.0, %v4805_v36  ;;  %v3593_v8 = vmul.f32 %v4805_v36, %v3426_v16 }
0x25c9   :  { %v3796_v34 = vadd.f32 -1.0, %v3591_v28 }
0x25cb   :  { %3595 = vrot.lane.b32.xlu0 %v3796_v34, %s4816_s17 }
0x263d   :  { %v3596_v37 = vpop.permute.xlu0 %3595 }
0x263e   :  { %v3598_v39 = vmul.f32 %v4805_v36, %v3596_v37 }
0x2640   :  { %3600 = vrot.lane.b32.xlu1 %v3598_v39, %s4817_s18 }
0x26b2   :  { %v3601_v40 = vpop.permute.xlu1 %3600 }
0x26b3   :  { %v3603_v38 = vadd.f32 %v3601_v40, %v3593_v8 }
0x26b5   :  { %4806 = vtanh.f32 %v3603_v38 }
0x26bf   :  { %v4807_v55 = vpop.eup %4806 }
0x26c0   :  { %3606 = vrot.lane.b32.xlu0 %v4807_v55, %s4816_s17 }
0x2732   :  { %v3607_v52 = vpop.permute.xlu0 %3606 }
0x2733   :  { %v3609_v44 = vmul.f32 %v4805_v36, %v3607_v52 }
0x2735   :  { %3617 = vrot.lane.b32.xlu1 %v3609_v44, %s4817_s18 }
0x27a7   :  { %v3618_v11 = vpop.permute.xlu1 %3617 }
0x27a8   :  { %4429 = vmatmul.mubr.msk.f32.vlgmr.msra.gmra.mrb[38].mxu1 %vm238_vm3, %v3618_v11 }
0x287b   :  { %v3687_v57 = vpop.f32.mrb[38].mxu1 }
0x287c   :  { %v3688_v58 = vadd.f32 %v3797_v53, %v3687_v57  ;;  %v4430_v0 = vpop.f32.mrb[39].mxu1 }
0x287e   :  { %v3799_v59 = vmul.f32 -1.442695, %v3688_v58 }
0x2880   :  { %4808 = vpow2.f32 %v3799_v59 }
0x288a   :  { %v4809_v60 = vpop.eup %4808 }
0x288b   :  { %v3694_v7 = vadd.f32 1.0, %v4809_v60 }
0x288d   :  { %4810 = vrcp.f32 %v3694_v7 }
0x2897   :  { %v4811_v61 = vpop.eup %4810 }
0x2898   :  { %3698 = vst.msk [vmem:[%s5573_s15] sm:$0x3] %vm3697_vm4, %v4811_v61 }

</bundles_post_ra>
